<compile_context>
chip_gen: v5e
topology: v5e:2x2
jax: 0.10.0
libtpu: 0.0.40
codegen_flags: <defaults>
</compile_context>

<pallas_src>
import functools

import jax
import jax.numpy as jnp
from jax import lax
from jax.experimental import pallas as pl
from jax.experimental.pallas import tpu as pltpu


# ------------------------- static per-image plan (row shifts / lengths) -------------------------

def _make_plan(H, W, cfg):
    """Per-image flat-shift bookkeeping (all Python ints).

    Flat-shift formulation: a feature map is a 2-D matrix [rows, channels-on-lanes] where the
    value for grid position (i, j) lives at flat row i*ry + j*rx (top-left pixel of its
    receptive field).  A KxK conv / pool is then a sum / max over row-shifted slices; rows in
    between valid positions hold finite garbage that no valid output ever reads.
    """
    ry, rx, h, w = W, 1, H, W

    def layer(k, s):
        nonlocal ry, rx, h, w
        dj = tuple(j * rx for j in range(k))   # column taps (small, possibly unaligned)
        di = tuple(i * ry for i in range(k))   # row taps (multiples of W -> sublane-aligned)
        h, w = (h - k) // s + 1, (w - k) // s + 1
        ry, rx = ry * s, rx * s
        return dj, di

    c1_dj, c1_di = layer(cfg["conv_size1"], cfg["conv_stride1"])
    p1_dj, p1_di = layer(cfg["maxp_size1"], cfg["maxp_stride1"])
    c2_dj, c2_di = layer(cfg["conv_size2"], cfg["conv_stride2"])
    p2_dj, p2_di = layer(cfg["maxp_size2"], cfg["maxp_stride2"])
    ph2, pw2 = h, w

    out_rows = tuple(i * ry + j * rx for i in range(ph2) for j in range(pw2))

    rup8 = lambda v: -(-v // 8) * 8            # round lengths up to whole vreg row-groups
    l_p2 = rup8(max(out_rows) + 1)
    l_c2 = rup8(l_p2 + p2_di[-1] + p2_dj[-1])
    l_p1 = rup8(l_c2 + c2_di[-1] + c2_dj[-1])
    l_c1 = rup8(l_p1 + p1_di[-1] + p1_dj[-1])
    need = l_c1 + c1_di[-1] + c1_dj[-1]
    # Valid receptive chains never cross the per-image row block (VALID geometry).
    assert need <= H * W, "flat-shift plan exceeds the per-image row count"
    assert (H * W) % 8 == 0, "per-image row block must be sublane aligned"

    conv1_taps = tuple(di + dj for di in c1_di for dj in c1_dj)   # di-major, matches w1 packing

    plan = dict(l_c1=l_c1, l_p1=l_p1, l_c2=l_c2, l_p2=l_p2,
                p1_dj=p1_dj, p1_di=p1_di,
                c2_dj=c2_dj, c2_di=c2_di,
                p2_dj=p2_dj, p2_di=p2_di)
    return plan, conv1_taps, out_rows, ph2, pw2


# ------------------------- the single fused Pallas kernel (one image per grid step) -------------------------

def _fused_cnn_kernel(x_ref, w1_ref, b1_ref, w2_ref, b2_ref, o_ref,
                      c1_ref, m1_ref, c2_ref, *,
                      l_c1, l_p1, l_c2, l_p2,
                      p1_dj, p1_di, c2_dj, c2_di, p2_dj, p2_di, k2):
    f32 = jnp.float32

    # ---- stage 1: conv1 as ONE im2col matmul (input pre-packed on lanes) + bias + relu ----
    c1 = jnp.dot(x_ref[0:l_c1, :], w1_ref[...], preferred_element_type=f32)
    c1_ref[...] = jnp.maximum(c1 + b1_ref[...], 0.0)

    # ---- max-pool1: load each dj column-shift once, then sublane-aligned di taps (VPU) ----
    m1 = None
    for dj in p1_dj:
        col = c1_ref[dj:dj + l_p1 + p1_di[-1], :]          # 1 aligned + 1 unaligned load
        for d in p1_di:                                    # d is a multiple of 8 -> free pick
            sl = col[d:d + l_p1, :]
            m1 = sl if m1 is None else jnp.maximum(m1, sl)
    m1_ref[...] = m1

    # ---- stage 2: conv2 -- dj pre-shift once, aligned di taps on the MXU, + bias + sigmoid ----
    acc = None
    for jdx, dj in enumerate(c2_dj):
        col = m1_ref[dj:dj + l_c2 + c2_di[-1], :]          # <=2 unaligned loads total
        for idx, d in enumerate(c2_di):
            term = jnp.dot(col[d:d + l_c2, :], w2_ref[idx * k2 + jdx],
                           preferred_element_type=f32)
            acc = term if acc is None else acc + term
    c2_ref[...] = jax.nn.sigmoid(acc + b2_ref[...])

    # ---- max-pool2, emitted as one dense slab store (valid-row gather is in the XLA epilogue) ----
    m2 = None
    for dj in p2_dj:
        col = c2_ref[dj:dj + l_p2 + p2_di[-1], :]
        for d in p2_di:
            sl = col[d:d + l_p2, :]
            m2 = sl if m2 is None else jnp.maximum(m2, sl)
    o_ref[...] = m2


# ------------------------- wrapper (tiny XLA layout glue + pallas_call) -------------------------

def cnn_forward(x, w1, b1, w2, b2, cfg):
    N, C, H, W = x.shape
    F1, F2 = cfg["conv_feat1"], cfg["conv_feat2"]
    k1, k2 = cfg["conv_size1"], cfg["conv_size2"]
    HW = H * W

    plan, conv1_taps, out_rows, ph2, pw2 = _make_plan(H, W, cfg)
    l_p2 = plan["l_p2"]

    # One-time layout plumbing (55 KB): NCHW -> per-image flat rows + conv1 im2col lane pack.
    # Padding with zeros only ever lands in garbage rows that no valid output reads.
    x_rows = x.transpose(0, 2, 3, 1).reshape(N, HW, C).astype(jnp.float32)
    cols = []
    for s in conv1_taps:
        shifted = x_rows[:, s:, :] if s else x_rows
        if s:
            shifted = jnp.pad(shifted, ((0, 0), (0, s), (0, 0)))
        cols.append(shifted)
    x_im2col = jnp.concatenate(cols, axis=-1).reshape(N * HW, k1 * k1 * C)

    # Weight / bias repacking (a few hundred floats).
    w1_p = w1.transpose(2, 3, 1, 0).reshape(k1 * k1 * C, F1).astype(jnp.float32)   # im2col packed
    w2_k = w2.transpose(2, 3, 1, 0).reshape(k2 * k2, F1, F2).astype(jnp.float32)   # per-tap [Cin,F2]
    b1_r = b1.reshape(1, F1).astype(jnp.float32)
    b2_r = b2.reshape(1, F2).astype(jnp.float32)

    kernel = functools.partial(_fused_cnn_kernel, k2=k2, **plan)

    grid_spec = pltpu.PrefetchScalarGridSpec(
        num_scalar_prefetch=0,
        grid=(N,),
        in_specs=[
            pl.BlockSpec((HW, k1 * k1 * C), lambda n: (n, 0)),     # one image's rows per step
            pl.BlockSpec((k1 * k1 * C, F1), lambda n: (0, 0)),     # weights resident
            pl.BlockSpec((1, F1), lambda n: (0, 0)),
            pl.BlockSpec((k2 * k2, F1, F2), lambda n: (0, 0, 0)),
            pl.BlockSpec((1, F2), lambda n: (0, 0)),
        ],
        out_specs=pl.BlockSpec((l_p2, F2), lambda n: (n, 0)),      # dense per-image slab
        scratch_shapes=[
            pltpu.VMEM((plan["l_c1"], F1), jnp.float32),           # c1
            pltpu.VMEM((plan["l_p1"], F1), jnp.float32),           # m1
            pltpu.VMEM((plan["l_c2"], F2), jnp.float32),           # c2
        ],
    )

    out = pl.pallas_call(
        kernel,
        out_shape=jax.ShapeDtypeStruct((N * l_p2, F2), jnp.float32),
        grid_spec=grid_spec,
        compiler_params=pltpu.CompilerParams(
            dimension_semantics=("parallel",),        # one image per TensorCore on v7x
            allow_input_fusion=[True] * 5,            # fold the repack/im2col into the launch
        ),
    )(x_im2col, w1_p, b1_r, w2_k, b2_r)

    # Tiny XLA epilogue on 2*72*8 floats: pick the 4 valid rows per image, NCHW flatten order.
    sel = out.reshape(N, l_p2, F2)[:, jnp.asarray(out_rows), :]
    return sel.reshape(N, ph2, pw2, F2).transpose(0, 3, 1, 2).reshape(-1)


# ------------------------- plain-JAX reference -------------------------

def cnn_reference(x, w1, b1, w2, b2, cfg):
    dn = ("NCHW", "OIHW", "NCHW")

    def pool(a, k, s):
        return lax.reduce_window(a, -jnp.inf, lax.max,
                                 (1, 1, k, k), (1, 1, s, s), "VALID")

    a = lax.conv_general_dilated(x, w1, (cfg["conv_stride1"],) * 2, "VALID",
                                 dimension_numbers=dn) + b1[None, :, None, None]
    a = pool(jax.nn.relu(a), cfg["maxp_size1"], cfg["maxp_stride1"])
    a = lax.conv_general_dilated(a, w2, (cfg["conv_stride2"],) * 2, "VALID",
                                 dimension_numbers=dn) + b2[None, :, None, None]
    a = pool(jax.nn.sigmoid(a), cfg["maxp_size2"], cfg["maxp_stride2"])
    return a.reshape(-1)


# ------------------------- main -------------------------

if __name__ == "__main__":
    cfg = dict(conv_feat1=4, conv_size1=3, conv_stride1=1,
               maxp_size1=2, maxp_stride1=2,
               conv_feat2=8, conv_size2=3, conv_stride2=1,
               maxp_size2=2, maxp_stride2=2)
    C_IN = 3                                   # Cnn._number_input_channels
    N, H, W = 2, 16, 16

    key = jax.random.PRNGKey(0)
    k_x, k_ind, k_b1, k_b2 = jax.random.split(key, 4)

    # deterministic "individual" vector -> conv weights (torch layout [F, C, kh, kw])
    w1_size = cfg["conv_feat1"] * C_IN * cfg["conv_size1"] ** 2                 # 108
    w2_size = cfg["conv_feat2"] * cfg["conv_feat1"] * cfg["conv_size2"] ** 2    # 288
    individual = jax.random.normal(k_ind, (w1_size + w2_size,), jnp.float32) * 0.1
    w1 = individual[:w1_size].reshape(cfg["conv_feat1"], C_IN,
                                      cfg["conv_size1"], cfg["conv_size1"])
    w2 = individual[w1_size:].reshape(cfg["conv_feat2"], cfg["conv_feat1"],
                                      cfg["conv_size2"], cfg["conv_size2"])
    # nn.Conv2d keeps its default-initialized biases (the individual only carries weights);
    # initialize them deterministically (uniform in +/- 1/sqrt(fan_in), torch-style).
    bound1 = 1.0 / (C_IN * cfg["conv_size1"] ** 2) ** 0.5
    bound2 = 1.0 / (cfg["conv_feat1"] * cfg["conv_size2"] ** 2) ** 0.5
    b1 = jax.random.uniform(k_b1, (cfg["conv_feat1"],), jnp.float32, -bound1, bound1)
    b2 = jax.random.uniform(k_b2, (cfg["conv_feat2"],), jnp.float32, -bound2, bound2)

    x = jax.random.normal(k_x, (N, C_IN, H, W), jnp.float32)

    fwd = jax.jit(lambda xx, a1, c1, a2, c2: cnn_forward(xx, a1, c1, a2, c2, cfg))
    out = jax.block_until_ready(fwd(x, w1, b1, w2, b2))
    ref = jax.block_until_ready(cnn_reference(x, w1, b1, w2, b2, cfg))

    assert out.shape == ref.shape, (out.shape, ref.shape)
    assert jnp.allclose(out, ref, atol=1e-4, rtol=1e-4), float(jnp.max(jnp.abs(out - ref)))
    print("KERNEL_OK")
</pallas_src>

<mosaic_0001>
module attributes {stable_mosaic.version = 11 : i64} {
  func.func @_fused_cnn_kernel(%arg0: i32, %arg1: memref<256x27xf32, #tpu.memory_space<vmem>>, %arg2: memref<27x4xf32, #tpu.memory_space<vmem>>, %arg3: memref<1x4xf32, #tpu.memory_space<vmem>>, %arg4: memref<9x4x8xf32, #tpu.memory_space<vmem>>, %arg5: memref<1x8xf32, #tpu.memory_space<vmem>>, %arg6: memref<72x8xf32, #tpu.memory_space<vmem>>, %arg7: memref<208x4xf32, #tpu.memory_space<vmem>>, %arg8: memref<184x4xf32, #tpu.memory_space<vmem>>, %arg9: memref<112x8xf32, #tpu.memory_space<vmem>>) attributes {dimension_semantics = [#tpu.dimension_semantics<parallel>], iteration_bounds = array<i64: 2>, scalar_prefetch = 0 : i64, scratch_operands = 3 : i64, tpu.core_type = #tpu.core_type<tc>, window_params = [{transform_indices = @transform_0, window_bounds = array<i64: 256, 27>}, {pipeline_mode = #tpu.pipeline_mode<synchronous>, transform_indices = @transform_1, window_bounds = array<i64: 27, 4>}, {pipeline_mode = #tpu.pipeline_mode<synchronous>, transform_indices = @transform_2, window_bounds = array<i64: 1, 4>}, {pipeline_mode = #tpu.pipeline_mode<synchronous>, transform_indices = @transform_3, window_bounds = array<i64: 9, 4, 8>}, {pipeline_mode = #tpu.pipeline_mode<synchronous>, transform_indices = @transform_4, window_bounds = array<i64: 1, 8>}, {transform_indices = @transform_5, window_bounds = array<i64: 72, 8>}]} {
    %c0 = arith.constant 0 : index
    %c0_0 = arith.constant 0 : index
    %0 = vector.load %arg1[%c0, %c0_0] : memref<256x27xf32, #tpu.memory_space<vmem>>, vector<208x27xf32>
    %c0_1 = arith.constant 0 : index
    %c0_2 = arith.constant 0 : index
    %1 = vector.load %arg2[%c0_1, %c0_2] : memref<27x4xf32, #tpu.memory_space<vmem>>, vector<27x4xf32>
    %cst = arith.constant dense<0.000000e+00> : vector<208x4xf32>
    %2 = tpu.matmul %0, %1, %cst {dimension_numbers = #tpu.dot_dimension_numbers<[1], [0], [0], [1], [0, 0, 1, 1], [], []>} : vector<208x27xf32>, vector<27x4xf32>, vector<208x4xf32> -> vector<208x4xf32>
    %c0_3 = arith.constant 0 : index
    %c0_4 = arith.constant 0 : index
    %3 = vector.load %arg3[%c0_3, %c0_4] : memref<1x4xf32, #tpu.memory_space<vmem>>, vector<1x4xf32>
    %4 = vector.broadcast %3 : vector<1x4xf32> to vector<208x4xf32>
    %5 = arith.addf %2, %4 : vector<208x4xf32>
    %cst_5 = arith.constant 0.000000e+00 : f32
    %6 = vector.broadcast %cst_5 : f32 to vector<208x4xf32>
    %7 = arith.maximumf %5, %6 : vector<208x4xf32>
    %c0_6 = arith.constant 0 : index
    %c0_7 = arith.constant 0 : index
    %8 = vector.load %arg7[%c0_6, %c0_7] : memref<208x4xf32, #tpu.memory_space<vmem>>, vector<208x4xf32>
    tpu.vector_store %arg7[%c0_6, %c0_7], %7 {strides = array<i32>} : memref<208x4xf32, #tpu.memory_space<vmem>>, vector<208x4xf32>,
    %c0_8 = arith.constant 0 : index
    %c0_9 = arith.constant 0 : index
    %9 = vector.load %arg7[%c0_8, %c0_9] : memref<208x4xf32, #tpu.memory_space<vmem>>, vector<200x4xf32>
    %10 = vector.extract_strided_slice %9 {offsets = [0, 0], sizes = [184, 4], strides = [1, 1]} : vector<200x4xf32> to vector<184x4xf32>
    %11 = vector.extract_strided_slice %9 {offsets = [16, 0], sizes = [184, 4], strides = [1, 1]} : vector<200x4xf32> to vector<184x4xf32>
    %12 = arith.maximumf %10, %11 : vector<184x4xf32>
    %c1 = arith.constant 1 : index
    %c0_10 = arith.constant 0 : index
    %13 = vector.load %arg7[%c1, %c0_10] : memref<208x4xf32, #tpu.memory_space<vmem>>, vector<200x4xf32>
    %14 = vector.extract_strided_slice %13 {offsets = [0, 0], sizes = [184, 4], strides = [1, 1]} : vector<200x4xf32> to vector<184x4xf32>
    %15 = arith.maximumf %12, %14 : vector<184x4xf32>
    %16 = vector.extract_strided_slice %13 {offsets = [16, 0], sizes = [184, 4], strides = [1, 1]} : vector<200x4xf32> to vector<184x4xf32>
    %17 = arith.maximumf %15, %16 : vector<184x4xf32>
    %c0_11 = arith.constant 0 : index
    %c0_12 = arith.constant 0 : index
    %18 = vector.load %arg8[%c0_11, %c0_12] : memref<184x4xf32, #tpu.memory_space<vmem>>, vector<184x4xf32>
    tpu.vector_store %arg8[%c0_11, %c0_12], %17 {strides = array<i32>} : memref<184x4xf32, #tpu.memory_space<vmem>>, vector<184x4xf32>,
    %c0_13 = arith.constant 0 : index
    %c0_14 = arith.constant 0 : index
    %19 = vector.load %arg8[%c0_13, %c0_14] : memref<184x4xf32, #tpu.memory_space<vmem>>, vector<176x4xf32>
    %20 = vector.extract_strided_slice %19 {offsets = [0, 0], sizes = [112, 4], strides = [1, 1]} : vector<176x4xf32> to vector<112x4xf32>
    %c0_15 = arith.constant 0 : index
    %c0_16 = arith.constant 0 : index
    %c0_17 = arith.constant 0 : index
    %21 = vector.load %arg4[%c0_15, %c0_16, %c0_17] : memref<9x4x8xf32, #tpu.memory_space<vmem>>, vector<1x4x8xf32>
    %22 = vector.shape_cast %21 : vector<1x4x8xf32> to vector<4x8xf32>
    %cst_18 = arith.constant dense<0.000000e+00> : vector<112x8xf32>
    %23 = tpu.matmul %20, %22, %cst_18 {dimension_numbers = #tpu.dot_dimension_numbers<[1], [0], [0], [1], [0, 0, 1, 1], [], []>} : vector<112x4xf32>, vector<4x8xf32>, vector<112x8xf32> -> vector<112x8xf32>
    %24 = vector.extract_strided_slice %19 {offsets = [32, 0], sizes = [112, 4], strides = [1, 1]} : vector<176x4xf32> to vector<112x4xf32>
    %c3 = arith.constant 3 : index
    %c0_19 = arith.constant 0 : index
    %c0_20 = arith.constant 0 : index
    %25 = vector.load %arg4[%c3, %c0_19, %c0_20] : memref<9x4x8xf32, #tpu.memory_space<vmem>>, vector<1x4x8xf32>
    %26 = vector.shape_cast %25 : vector<1x4x8xf32> to vector<4x8xf32>
    %cst_21 = arith.constant dense<0.000000e+00> : vector<112x8xf32>
    %27 = tpu.matmul %24, %26, %cst_21 {dimension_numbers = #tpu.dot_dimension_numbers<[1], [0], [0], [1], [0, 0, 1, 1], [], []>} : vector<112x4xf32>, vector<4x8xf32>, vector<112x8xf32> -> vector<112x8xf32>
    %28 = arith.addf %23, %27 : vector<112x8xf32>
    %29 = vector.extract_strided_slice %19 {offsets = [64, 0], sizes = [112, 4], strides = [1, 1]} : vector<176x4xf32> to vector<112x4xf32>
    %c6 = arith.constant 6 : index
    %c0_22 = arith.constant 0 : index
    %c0_23 = arith.constant 0 : index
    %30 = vector.load %arg4[%c6, %c0_22, %c0_23] : memref<9x4x8xf32, #tpu.memory_space<vmem>>, vector<1x4x8xf32>
    %31 = vector.shape_cast %30 : vector<1x4x8xf32> to vector<4x8xf32>
    %cst_24 = arith.constant dense<0.000000e+00> : vector<112x8xf32>
    %32 = tpu.matmul %29, %31, %cst_24 {dimension_numbers = #tpu.dot_dimension_numbers<[1], [0], [0], [1], [0, 0, 1, 1], [], []>} : vector<112x4xf32>, vector<4x8xf32>, vector<112x8xf32> -> vector<112x8xf32>
    %33 = arith.addf %28, %32 : vector<112x8xf32>
    %c2 = arith.constant 2 : index
    %c0_25 = arith.constant 0 : index
    %34 = vector.load %arg8[%c2, %c0_25] : memref<184x4xf32, #tpu.memory_space<vmem>>, vector<176x4xf32>
    %35 = vector.extract_strided_slice %34 {offsets = [0, 0], sizes = [112, 4], strides = [1, 1]} : vector<176x4xf32> to vector<112x4xf32>
    %c1_26 = arith.constant 1 : index
    %c0_27 = arith.constant 0 : index
    %c0_28 = arith.constant 0 : index
    %36 = vector.load %arg4[%c1_26, %c0_27, %c0_28] : memref<9x4x8xf32, #tpu.memory_space<vmem>>, vector<1x4x8xf32>
    %37 = vector.shape_cast %36 : vector<1x4x8xf32> to vector<4x8xf32>
    %cst_29 = arith.constant dense<0.000000e+00> : vector<112x8xf32>
    %38 = tpu.matmul %35, %37, %cst_29 {dimension_numbers = #tpu.dot_dimension_numbers<[1], [0], [0], [1], [0, 0, 1, 1], [], []>} : vector<112x4xf32>, vector<4x8xf32>, vector<112x8xf32> -> vector<112x8xf32>
    %39 = arith.addf %33, %38 : vector<112x8xf32>
    %40 = vector.extract_strided_slice %34 {offsets = [32, 0], sizes = [112, 4], strides = [1, 1]} : vector<176x4xf32> to vector<112x4xf32>
    %c4 = arith.constant 4 : index
    %c0_30 = arith.constant 0 : index
    %c0_31 = arith.constant 0 : index
    %41 = vector.load %arg4[%c4, %c0_30, %c0_31] : memref<9x4x8xf32, #tpu.memory_space<vmem>>, vector<1x4x8xf32>
    %42 = vector.shape_cast %41 : vector<1x4x8xf32> to vector<4x8xf32>
    %cst_32 = arith.constant dense<0.000000e+00> : vector<112x8xf32>
    %43 = tpu.matmul %40, %42, %cst_32 {dimension_numbers = #tpu.dot_dimension_numbers<[1], [0], [0], [1], [0, 0, 1, 1], [], []>} : vector<112x4xf32>, vector<4x8xf32>, vector<112x8xf32> -> vector<112x8xf32>
    %44 = arith.addf %39, %43 : vector<112x8xf32>
    %45 = vector.extract_strided_slice %34 {offsets = [64, 0], sizes = [112, 4], strides = [1, 1]} : vector<176x4xf32> to vector<112x4xf32>
    %c7 = arith.constant 7 : index
    %c0_33 = arith.constant 0 : index
    %c0_34 = arith.constant 0 : index
    %46 = vector.load %arg4[%c7, %c0_33, %c0_34] : memref<9x4x8xf32, #tpu.memory_space<vmem>>, vector<1x4x8xf32>
    %47 = vector.shape_cast %46 : vector<1x4x8xf32> to vector<4x8xf32>
    %cst_35 = arith.constant dense<0.000000e+00> : vector<112x8xf32>
    %48 = tpu.matmul %45, %47, %cst_35 {dimension_numbers = #tpu.dot_dimension_numbers<[1], [0], [0], [1], [0, 0, 1, 1], [], []>} : vector<112x4xf32>, vector<4x8xf32>, vector<112x8xf32> -> vector<112x8xf32>
    %49 = arith.addf %44, %48 : vector<112x8xf32>
    %c4_36 = arith.constant 4 : index
    %c0_37 = arith.constant 0 : index
    %50 = vector.load %arg8[%c4_36, %c0_37] : memref<184x4xf32, #tpu.memory_space<vmem>>, vector<176x4xf32>
    %51 = vector.extract_strided_slice %50 {offsets = [0, 0], sizes = [112, 4], strides = [1, 1]} : vector<176x4xf32> to vector<112x4xf32>
    %c2_38 = arith.constant 2 : index
    %c0_39 = arith.constant 0 : index
    %c0_40 = arith.constant 0 : index
    %52 = vector.load %arg4[%c2_38, %c0_39, %c0_40] : memref<9x4x8xf32, #tpu.memory_space<vmem>>, vector<1x4x8xf32>
    %53 = vector.shape_cast %52 : vector<1x4x8xf32> to vector<4x8xf32>
    %cst_41 = arith.constant dense<0.000000e+00> : vector<112x8xf32>
    %54 = tpu.matmul %51, %53, %cst_41 {dimension_numbers = #tpu.dot_dimension_numbers<[1], [0], [0], [1], [0, 0, 1, 1], [], []>} : vector<112x4xf32>, vector<4x8xf32>, vector<112x8xf32> -> vector<112x8xf32>
    %55 = arith.addf %49, %54 : vector<112x8xf32>
    %56 = vector.extract_strided_slice %50 {offsets = [32, 0], sizes = [112, 4], strides = [1, 1]} : vector<176x4xf32> to vector<112x4xf32>
    %c5 = arith.constant 5 : index
    %c0_42 = arith.constant 0 : index
    %c0_43 = arith.constant 0 : index
    %57 = vector.load %arg4[%c5, %c0_42, %c0_43] : memref<9x4x8xf32, #tpu.memory_space<vmem>>, vector<1x4x8xf32>
    %58 = vector.shape_cast %57 : vector<1x4x8xf32> to vector<4x8xf32>
    %cst_44 = arith.constant dense<0.000000e+00> : vector<112x8xf32>
    %59 = tpu.matmul %56, %58, %cst_44 {dimension_numbers = #tpu.dot_dimension_numbers<[1], [0], [0], [1], [0, 0, 1, 1], [], []>} : vector<112x4xf32>, vector<4x8xf32>, vector<112x8xf32> -> vector<112x8xf32>
    %60 = arith.addf %55, %59 : vector<112x8xf32>
    %61 = vector.extract_strided_slice %50 {offsets = [64, 0], sizes = [112, 4], strides = [1, 1]} : vector<176x4xf32> to vector<112x4xf32>
    %c8 = arith.constant 8 : index
    %c0_45 = arith.constant 0 : index
    %c0_46 = arith.constant 0 : index
    %62 = vector.load %arg4[%c8, %c0_45, %c0_46] : memref<9x4x8xf32, #tpu.memory_space<vmem>>, vector<1x4x8xf32>
    %63 = vector.shape_cast %62 : vector<1x4x8xf32> to vector<4x8xf32>
    %cst_47 = arith.constant dense<0.000000e+00> : vector<112x8xf32>
    %64 = tpu.matmul %61, %63, %cst_47 {dimension_numbers = #tpu.dot_dimension_numbers<[1], [0], [0], [1], [0, 0, 1, 1], [], []>} : vector<112x4xf32>, vector<4x8xf32>, vector<112x8xf32> -> vector<112x8xf32>
    %65 = arith.addf %60, %64 : vector<112x8xf32>
    %c0_48 = arith.constant 0 : index
    %c0_49 = arith.constant 0 : index
    %66 = vector.load %arg5[%c0_48, %c0_49] : memref<1x8xf32, #tpu.memory_space<vmem>>, vector<1x8xf32>
    %67 = vector.broadcast %66 : vector<1x8xf32> to vector<112x8xf32>
    %68 = arith.addf %65, %67 : vector<112x8xf32>
    %69 = arith.negf %68 : vector<112x8xf32>
    %70 = math.exp %69 : vector<112x8xf32>
    %cst_50 = arith.constant 1.000000e+00 : f32
    %71 = vector.broadcast %cst_50 : f32 to vector<112x8xf32>
    %72 = arith.addf %71, %70 : vector<112x8xf32>
    %73 = arith.divf %71, %72 : vector<112x8xf32>
    %c0_51 = arith.constant 0 : index
    %c0_52 = arith.constant 0 : index
    %74 = vector.load %arg9[%c0_51, %c0_52] : memref<112x8xf32, #tpu.memory_space<vmem>>, vector<112x8xf32>
    tpu.vector_store %arg9[%c0_51, %c0_52], %73 {strides = array<i32>} : memref<112x8xf32, #tpu.memory_space<vmem>>, vector<112x8xf32>,
    %c0_53 = arith.constant 0 : index
    %c0_54 = arith.constant 0 : index
    %75 = vector.load %arg9[%c0_53, %c0_54] : memref<112x8xf32, #tpu.memory_space<vmem>>, vector<104x8xf32>
    %76 = vector.extract_strided_slice %75 {offsets = [0, 0], sizes = [72, 8], strides = [1, 1]} : vector<104x8xf32> to vector<72x8xf32>
    %77 = vector.extract_strided_slice %75 {offsets = [32, 0], sizes = [72, 8], strides = [1, 1]} : vector<104x8xf32> to vector<72x8xf32>
    %78 = arith.maximumf %76, %77 : vector<72x8xf32>
    %c2_55 = arith.constant 2 : index
    %c0_56 = arith.constant 0 : index
    %79 = vector.load %arg9[%c2_55, %c0_56] : memref<112x8xf32, #tpu.memory_space<vmem>>, vector<104x8xf32>
    %80 = vector.extract_strided_slice %79 {offsets = [0, 0], sizes = [72, 8], strides = [1, 1]} : vector<104x8xf32> to vector<72x8xf32>
    %81 = arith.maximumf %78, %80 : vector<72x8xf32>
    %82 = vector.extract_strided_slice %79 {offsets = [32, 0], sizes = [72, 8], strides = [1, 1]} : vector<104x8xf32> to vector<72x8xf32>
    %83 = arith.maximumf %81, %82 : vector<72x8xf32>
    %c0_57 = arith.constant 0 : index
    %c0_58 = arith.constant 0 : index
    %84 = vector.load %arg6[%c0_57, %c0_58] : memref<72x8xf32, #tpu.memory_space<vmem>>, vector<72x8xf32>
    tpu.vector_store %arg6[%c0_57, %c0_58], %83 {strides = array<i32>} : memref<72x8xf32, #tpu.memory_space<vmem>>, vector<72x8xf32>,
    return
  }
  func.func @transform_0(%arg0: i32) -> (i32, i32) {
    %c0_i32 = arith.constant 0 : i32
    %c0_i32_0 = arith.constant 0 : i32
    return %arg0, %c0_i32 : i32, i32
  }
  func.func @transform_1(%arg0: i32) -> (i32, i32) {
    %c0_i32 = arith.constant 0 : i32
    %c0_i32_0 = arith.constant 0 : i32
    %c0_i32_1 = arith.constant 0 : i32
    return %c0_i32, %c0_i32_0 : i32, i32
  }
  func.func @transform_2(%arg0: i32) -> (i32, i32) {
    %c0_i32 = arith.constant 0 : i32
    %c0_i32_0 = arith.constant 0 : i32
    %c0_i32_1 = arith.constant 0 : i32
    return %c0_i32, %c0_i32_0 : i32, i32
  }
  func.func @transform_3(%arg0: i32) -> (i32, i32, i32) {
    %c0_i32 = arith.constant 0 : i32
    %c0_i32_0 = arith.constant 0 : i32
    %c0_i32_1 = arith.constant 0 : i32
    %c0_i32_2 = arith.constant 0 : i32
    return %c0_i32, %c0_i32_0, %c0_i32_1 : i32, i32, i32
  }
  func.func @transform_4(%arg0: i32) -> (i32, i32) {
    %c0_i32 = arith.constant 0 : i32
    %c0_i32_0 = arith.constant 0 : i32
    %c0_i32_1 = arith.constant 0 : i32
    return %c0_i32, %c0_i32_0 : i32, i32
  }
  func.func @transform_5(%arg0: i32) -> (i32, i32) {
    %c0_i32 = arith.constant 0 : i32
    %c0_i32_0 = arith.constant 0 : i32
    return %arg0, %c0_i32 : i32, i32
  }
}

</mosaic_0001>

<bundles_post_ra>
// kernel: _lambda_.2
= control target key start
LH: loop header
LB: loop body
LE: loop exit
PB: predicated region body
PF: predicated region fallthrough
CT: control target
= control target key end

     0   :  { %s2302_s18 = smov 0   ;;  %s3118_s0 = inlined_call_operand.vmem [shape: f32[512,27], index: 0, kind: input, shape index: {}]   ;;  %s3119_s1 = inlined_call_operand.vmem [shape: f32[27,4], index: 1, kind: input, shape index: {}]   ;;  %s3120_s2 = inlined_call_operand.vmem [shape: f32[9,4,8], index: 2, kind: input, shape index: {}]   ;;  %s3121_s3 = inlined_call_operand.vmem [shape: f32[8], index: 3, kind: input, shape index: {}]   ;;  %s3122_s4 = inlined_call_operand.vmem [shape: f32[4], index: 4, kind: input, shape index: {}]   ;;  %s3123_s5 = inlined_call_operand.vmem [shape: f32[144,8], index: 5, kind: output, shape index: {}]  }
   0x1 LB: > { %s1998_s19 = sadd.s32 4294967295, %s2270_s18   ;;  %p2002_p0 = scmp.ge.s32.totalorder %s2270_s18, 1  ;;  %s2270_s18 = sphi %s2302_s18, %s15_s18  }
   0x2   : > { %p188_p1 = scmp.lt.s32.totalorder %s2270_s18, 3 }
   0x4   : > { %p189_p2 = pnand %p2002_p0, %p188_p1 }
   0x6   : > { %192 = sbr.rel (%p189_p2) target bundleno = 757 (0x2f5), region = 40 }
   0xb   : > { %v265_v0 = vld [vmem:[%s3119_s1 + $0x18] sm:$0x7]  ;;  %vm349_vm0 = vcmask 1042432   ;;  %v264_v1 = vld [vmem:[%s3119_s1 + $0x10] sm:$0xff]  ;;  %s2003_s24 = sshll.u32 %s1998_s19, 5  ;;  %v263_v2 = vld [vmem:[%s3119_s1 + $0x8] sm:$0xff] }
   0xc   : > { %2006 = vmatpush.msk.msra.mxu0 %vm349_vm0, %v265_v0  ;;  %p217_p3 = scmp.lt.s32.totalorder %s2003_s24, 63  ;;  %2192 = vmatpush.msk.msra.mxu3 %vm349_vm0, %v265_v0  ;;  %v262_v3 = vld [vmem:[%s3119_s1] sm:$0xff]  ;;  %vm270_vm1 = vcmask 220160   ;;  %vm474_vm2 = vcmask 31744   ;;  %vm710_vm3 = vcmask 1043456   ;;  %vm1865_vm7 = vcmask 64512  }
   0xd   : > { %v228_v15 = vld [vmem:[%s3122_s4] sm:$0x1]  ;;  %v2128_v46 = vld [vmem:[%s3120_s2 + $0x8] sm:$0xf]  ;;  %v2033_v0 = vld [vmem:[%s3120_s2 + $0xc] sm:$0xf] }
   0xe   : > { %366 = vmatpush.msra.mxu0 %v264_v1  ;;  %s3125_s24 = smov (!%p217_p3, %s2003_s24), 63  ;;  %2193 = vmatpush.msra.mxu3 %v264_v1  ;;  %231 = vst [vmem:[#allocation5] sm:$0x1] %v228_v15  ;;  %v665_v30 = vld [vmem:[%s3120_s2] sm:$0xf] }
   0xf   : > { %s2004_s29 = sshll.u32 %s3125_s24, 3  ;;  %2049 = vmatpush.msk.msra.mxu2 %vm710_vm3, %v665_v30  ;;  %2034 = vmatpush.msk.msra.mxu1 %vm710_vm3, %v2033_v0 }
  0x10   : > { %367 = vmatpush.msra.mxu0 %v263_v2  ;;  %2194 = vmatpush.msra.mxu3 %v263_v2  ;;  %s2327_s7 = scalar_lea.vmem %s3118_s0, %s2004_s29 }
  0x11   : > { %v236_v4 = vld [vmem:[%s2327_s7] sm:$0xff]  ;;  %v237_v5 = vld [vmem:[%s2327_s7 + $0x8] sm:$0xff]  ;;  %v238_v6 = vld [vmem:[%s2327_s7 + $0x10] sm:$0xff] }
  0x12   : > { %368 = vmatpush.msra.mxu0 %v262_v3  ;;  %2195 = vmatpush.msra.mxu3 %v262_v3  ;;  %v239_v7 = vld [vmem:[%s2327_s7 + $0x18] sm:$0xff]  ;;  %v240_v8 = vld [vmem:[%s2327_s7 + $0x20] sm:$0xff]  ;;  %v241_v9 = vld [vmem:[%s2327_s7 + $0x28] sm:$0xff] }
  0x13   : > { %2007 = vmatmul.msk.f32.vlgmr.msra.gmra.mxu0 %vm270_vm1, %v236_v4  ;;  %v242_v10 = vld [vmem:[%s2327_s7 + $0x30] sm:$0xff]  ;;  %v243_v11 = vld [vmem:[%s2327_s7 + $0x38] sm:$0xff]  ;;  %v244_v12 = vld [vmem:[%s2327_s7 + $0x40] sm:$0xff] }
  0x14   : > { %v245_v13 = vld [vmem:[%s2327_s7 + $0x48] sm:$0xff]  ;;  %v246_v14 = vld [vmem:[%s2327_s7 + $0x50] sm:$0xff]  ;;  %v247_v16 = vld [vmem:[%s2327_s7 + $0x58] sm:$0xff]  ;;  %2129 = vmatpush.msk.msrb.mxu0 %vm710_vm3, %v2128_v46  ;;  %2196 = vmatpush.msk.msrb.mxu3 %vm710_vm3, %v2033_v0 }
  0x15   : > { %v248_v17 = vld [vmem:[%s2327_s7 + $0x60] sm:$0xff]  ;;  %v249_v18 = vld [vmem:[%s2327_s7 + $0x68] sm:$0xff]  ;;  %v250_v19 = vld [vmem:[%s2327_s7 + $0x70] sm:$0xff] }
  0x16   : > { %v251_v20 = vld [vmem:[%s2327_s7 + $0x78] sm:$0xff]  ;;  %v252_v23 = vld [vmem:[%s2327_s7 + $0x80] sm:$0xff]  ;;  %v253_v27 = vld [vmem:[%s2327_s7 + $0x88] sm:$0xff] }
  0x17   : > { %v2364_v21 = vld [vmem:[#allocation5] ss:$0 sm:$0xff]  ;;  %v254_v32 = vld [vmem:[%s2327_s7 + $0x90] sm:$0xff]  ;;  %v260_v37 = vld [vmem:[%s2327_s7 + $0xc0] sm:$0xff] }
  0x18   : > { %v255_v36 = vld [vmem:[%s2327_s7 + $0x98] sm:$0xff]  ;;  %2031 = vmatmul.msk.f32.vlgmr.msra.gmra.mxu3 %vm270_vm1, %v260_v37  ;;  %v256_v44 = vld [vmem:[%s2327_s7 + $0xa0] sm:$0xff]  ;;  %v257_v56 = vld [vmem:[%s2327_s7 + $0xa8] sm:$0xff] }
  0x19   : > { %2197 = vmatpush.msk.msra.mxu3 %vm710_vm3, %v665_v30  ;;  %v258_v4 = vld [vmem:[%s2327_s7 + $0xb0] sm:$0xff] }
  0x1b   : > { %2008 = vmatmul.msk.f32.gmra.mxu0 %vm270_vm1, %v237_v5 }
  0x23   : > { %2009 = vmatmul.msk.f32.gmra.mxu0 %vm270_vm1, %v238_v6 }
  0x2b   : > { %2010 = vmatmul.msk.f32.gmra.mxu0 %vm270_vm1, %v239_v7 }
  0x33   : > { %2011 = vmatmul.msk.f32.gmra.mxu0 %vm270_vm1, %v240_v8 }
  0x3b   : > { %2012 = vmatmul.msk.f32.gmra.mxu0 %vm270_vm1, %v241_v9 }
  0x43   : > { %2013 = vmatmul.msk.f32.gmra.mxu0 %vm270_vm1, %v242_v10 }
  0x4b   : > { %2014 = vmatmul.msk.f32.gmra.mxu0 %vm270_vm1, %v243_v11 }
  0x53   : > { %2015 = vmatmul.msk.f32.gmra.mxu0 %vm270_vm1, %v244_v12 }
  0x5b   : > { %2016 = vmatmul.msk.f32.gmra.mxu0 %vm270_vm1, %v245_v13 }
  0x63   : > { %2017 = vmatmul.msk.f32.gmra.mxu0 %vm270_vm1, %v246_v14  ;;  %v259_v14 = vld [vmem:[%s2327_s7 + $0xb8] sm:$0xff] }
  0x6b   : > { %2018 = vmatmul.msk.f32.gmra.mxu0 %vm270_vm1, %v247_v16 }
  0x73   : > { %2019 = vmatmul.msk.f32.gmra.mxu0 %vm270_vm1, %v248_v17 }
  0x7b   : > { %2020 = vmatmul.msk.f32.gmra.mxu0 %vm270_vm1, %v249_v18 }
  0x83   : > { %2021 = vmatmul.msk.f32.gmra.mxu0 %vm270_vm1, %v250_v19 }
  0x8b   : > { %2022 = vmatmul.msk.f32.gmra.mxu0 %vm270_vm1, %v251_v20 }
  0x90   : > { %v370_v22 = vpop.f32.mrf.mxu0 }
  0x91   : > { %v371_v24 = vadd.f32 %v2364_v21, %v370_v22 }
  0x93   : > { %v448_v25 = vmax.f32 %v371_v24, 0.0  ;;  %2023 = vmatmul.msk.f32.gmra.mxu0 %vm270_vm1, %v252_v23 }
  0x95   : > { %475 = vst.msk [vmem:[#allocation2] sm:$0xff] %vm474_vm2, %v448_v25 }
  0x98   : > { %v373_v26 = vpop.f32.mrf.mxu0 }
  0x99   : > { %v374_v28 = vadd.f32 %v2364_v21, %v373_v26 }
  0x9b   : > { %v449_v29 = vmax.f32 %v374_v28, 0.0  ;;  %2024 = vmatmul.msk.f32.gmra.mxu0 %vm270_vm1, %v253_v27 }
  0x9c   : > { %v501_v41 = vld [vmem:[#allocation2] sm:$0xff] }
  0x9d   : > { %476 = vst.msk [vmem:[#allocation2 + $0x8] sm:$0xff] %vm474_vm2, %v449_v29 }
  0xa0   : > { %v376_v31 = vpop.f32.mrf.mxu0 }
  0xa1   : > { %v377_v33 = vadd.f32 %v2364_v21, %v376_v31 }
  0xa3   : > { %v450_v34 = vmax.f32 %v377_v33, 0.0  ;;  %2025 = vmatmul.msk.f32.gmra.mxu0 %vm270_vm1, %v254_v32 }
  0xa4   : > { %v549_v47 = vld [vmem:[#allocation2 + $0x1] sm:$0xff] }
  0xa5   : > { %477 = vst.msk [vmem:[#allocation2 + $0x10] sm:$0xff] %vm474_vm2, %v450_v34  ;;  %v502_v53 = vld [vmem:[#allocation2 + $0x8] sm:$0xff] }
  0xa8   : > { %v379_v35 = vpop.f32.mrf.mxu0 }
  0xa9   : > { %v380_v38 = vadd.f32 %v2364_v21, %v379_v35 }
  0xab   : > { %v451_v39 = vmax.f32 %v380_v38, 0.0  ;;  %2026 = vmatmul.msk.f32.gmra.mxu0 %vm270_vm1, %v255_v36 }
  0xac   : > { %v503_v40 = vld [vmem:[#allocation2 + $0x10] sm:$0xff] }
  0xad   : > { %478 = vst.msk [vmem:[#allocation2 + $0x18] sm:$0xff] %vm474_vm2, %v451_v39  ;;  %v526_v42 = vmax.f32 %v501_v41, %v503_v40  ;;  %v550_v58 = vld [vmem:[#allocation2 + $0x9] sm:$0xff] }
  0xaf   : > { %v574_v49 = vmax.f32 %v526_v42, %v549_v47 }
  0xb0   : > { %v382_v43 = vpop.f32.mrf.mxu0 }
  0xb1   : > { %v383_v45 = vadd.f32 %v2364_v21, %v382_v43 }
  0xb3   : > { %v452_v48 = vmax.f32 %v383_v45, 0.0  ;;  %2027 = vmatmul.msk.f32.gmra.mxu0 %vm270_vm1, %v256_v44 }
  0xb4   : > { %v504_v50 = vld [vmem:[#allocation2 + $0x18] sm:$0xff] }
  0xb5   : > { %v551_v51 = vld [vmem:[#allocation2 + $0x11] sm:$0xff]  ;;  %479 = vst.msk [vmem:[#allocation2 + $0x20] sm:$0xff] %vm474_vm2, %v452_v48  ;;  %v527_v54 = vmax.f32 %v502_v53, %v504_v50 }
  0xb6   : > { %v597_v52 = vmax.f32 %v574_v49, %v551_v51 }
  0xb7   : > { %v575_v60 = vmax.f32 %v527_v54, %v550_v58 }
  0xb8   : > { %620 = vst.msk [vmem:[#allocation3] sm:$0xff] %vm474_vm2, %v597_v52  ;;  %v385_v55 = vpop.f32.mrf.mxu0 }
  0xb9   : > { %v386_v57 = vadd.f32 %v2364_v21, %v385_v55 }
  0xbb   : > { %v453_v59 = vmax.f32 %v386_v57, 0.0  ;;  %2028 = vmatmul.msk.f32.gmra.mxu0 %vm270_vm1, %v257_v56 }
  0xbc   : > { %v505_v61 = vld [vmem:[#allocation2 + $0x20] sm:$0xff] }
  0xbd   : > { %v552_v62 = vld [vmem:[#allocation2 + $0x19] sm:$0xff]  ;;  %480 = vst.msk [vmem:[#allocation2 + $0x28] sm:$0xff] %vm474_vm2, %v453_v59  ;;  %v528_v2 = vmax.f32 %v503_v40, %v505_v61 }
  0xbe   : > { %v598_v63 = vmax.f32 %v575_v60, %v552_v62 }
  0xbf   : > { %v643_v1 = vld [vmem:[#allocation3] sm:$0xff]  ;;  %v576_v7 = vmax.f32 %v528_v2, %v551_v51 }
  0xc0   : > { %2050 = vmatmul.msk.f32.vlgmr.msra.gmra.mxu2 %vm474_vm2, %v643_v1  ;;  %621 = vst.msk [vmem:[#allocation3 + $0x8] sm:$0xff] %vm474_vm2, %v598_v63  ;;  %v388_v3 = vpop.f32.mrf.mxu0 }
  0xc1   : > { %v389_v5 = vadd.f32 %v2364_v21, %v388_v3 }
  0xc3   : > { %v454_v6 = vmax.f32 %v389_v5, 0.0  ;;  %2029 = vmatmul.msk.f32.gmra.mxu0 %vm270_vm1, %v258_v4 }
  0xc4   : > { %v506_v8 = vld [vmem:[#allocation2 + $0x28] sm:$0xff] }
  0xc5   : > { %v553_v9 = vld [vmem:[#allocation2 + $0x21] sm:$0xff]  ;;  %481 = vst.msk [vmem:[#allocation2 + $0x30] sm:$0xff] %vm474_vm2, %v454_v6  ;;  %v529_v12 = vmax.f32 %v504_v50, %v506_v8 }
  0xc6   : > { %v599_v10 = vmax.f32 %v576_v7, %v553_v9 }
  0xc7   : > { %v644_v11 = vld [vmem:[#allocation3 + $0x8] sm:$0xff]  ;;  %v577_v17 = vmax.f32 %v529_v12, %v552_v62 }
  0xc8   : > { %2051 = vmatmul.msk.f32.gmra.mxu2 %vm474_vm2, %v644_v11  ;;  %622 = vst.msk [vmem:[#allocation3 + $0x10] sm:$0xff] %vm474_vm2, %v599_v10  ;;  %v391_v13 = vpop.f32.mrf.mxu0  ;;  %v1259_v26 = vld [vmem:[#allocation3 + $0x4] sm:$0xff] }
  0xc9   : > { %v392_v15 = vadd.f32 %v2364_v21, %v391_v13 }
  0xcb   : > { %v455_v16 = vmax.f32 %v392_v15, 0.0  ;;  %2030 = vmatmul.msk.f32.gmra.mxu0 %vm270_vm1, %v259_v14 }
  0xcc   : > { %v507_v18 = vld [vmem:[#allocation2 + $0x30] sm:$0xff] }
  0xcd   : > { %v554_v19 = vld [vmem:[#allocation2 + $0x29] sm:$0xff]  ;;  %482 = vst.msk [vmem:[#allocation2 + $0x38] sm:$0xff] %vm474_vm2, %v455_v16  ;;  %v530_v23 = vmax.f32 %v505_v61, %v507_v18 }
  0xce   : > { %v600_v20 = vmax.f32 %v577_v17, %v554_v19 }
  0xcf   : > { %v645_v22 = vld [vmem:[#allocation3 + $0x10] sm:$0xff]  ;;  %v578_v28 = vmax.f32 %v530_v23, %v553_v9 }
  0xd0   : > { %2052 = vmatmul.msk.f32.gmra.mxu2 %vm474_vm2, %v645_v22  ;;  %623 = vst.msk [vmem:[#allocation3 + $0x18] sm:$0xff] %vm474_vm2, %v600_v20  ;;  %v394_v24 = vpop.f32.mrf.mxu0  ;;  %v1260_v36 = vld [vmem:[#allocation3 + $0xc] sm:$0xff]  ;;  %v261_v20 = vld [vmem:[%s2327_s7 + $0xc8] sm:$0xff]  ;;  %s2983_s7 = smul.u32 9, %s1998_s19 }
  0xd1   : > { %v395_v25 = vadd.f32 %v2364_v21, %v394_v24  ;;  %2032 = vmatmul.msk.f32.gmra.mxu3 %vm270_vm1, %v261_v20 }
  0xd2   : > { %p223_p4 = scmp.lt.s32.totalorder %s2983_s7, 17 }
  0xd3   : > { %v456_v27 = vmax.f32 %v395_v25, 0.0  ;;  %2130 = vmatmul.msk.f32.vlgmr.msrb.gmra.mxu0 %vm474_vm2, %v1259_v26 }
  0xd4   : > { %v508_v29 = vld [vmem:[#allocation2 + $0x38] sm:$0xff]  ;;  %s3127_s7 = smov (!%p223_p4, %s2983_s7), 17 }
  0xd5   : > { %v555_v30 = vld [vmem:[#allocation2 + $0x31] sm:$0xff]  ;;  %483 = vst.msk [vmem:[#allocation2 + $0x40] sm:$0xff] %vm474_vm2, %v456_v27  ;;  %v531_v33 = vmax.f32 %v506_v8, %v508_v29  ;;  %s2005_s19 = sshll.u32 %s3127_s7, 3 }
  0xd6   : > { %v601_v31 = vmax.f32 %v578_v28, %v555_v30  ;;  %v2096_v8 = vld [vmem:[%s3120_s2 + $0x10] sm:$0xf]  ;;  %s3018_s10 = scalar_lea.vmem %s3123_s5, %s2005_s19 }
  0xd7   : > { %v646_v32 = vld [vmem:[#allocation3 + $0x18] sm:$0xff]  ;;  %v579_v38 = vmax.f32 %v531_v33, %v554_v19  ;;  %2097 = vmatpush.msk.msrb.mxu2 %vm710_vm3, %v2096_v8 }
  0xd8   : > { %2053 = vmatmul.msk.f32.gmra.mxu2 %vm474_vm2, %v646_v32  ;;  %624 = vst.msk [vmem:[#allocation3 + $0x20] sm:$0xff] %vm474_vm2, %v601_v31  ;;  %v397_v34 = vpop.f32.mrf.mxu0  ;;  %v1261_v46 = vld [vmem:[#allocation3 + $0x14] sm:$0xff] }
  0xd9   : > { %v398_v35 = vadd.f32 %v2364_v21, %v397_v34  ;;  %v2080_v31 = vld [vmem:[%s3120_s2 + $0x4] sm:$0xf] }
  0xda   : > { %2081 = vmatpush.msk.msrb.mxu1 %vm710_vm3, %v2080_v31 }
  0xdb   : > { %v457_v37 = vmax.f32 %v398_v35, 0.0  ;;  %2131 = vmatmul.msk.f32.gmra.mxu0 %vm474_vm2, %v1260_v36 }
  0xdc   : > { %v509_v39 = vld [vmem:[#allocation2 + $0x40] sm:$0xff] }
  0xdd   : > { %v556_v40 = vld [vmem:[#allocation2 + $0x39] sm:$0xff]  ;;  %484 = vst.msk [vmem:[#allocation2 + $0x48] sm:$0xff] %vm474_vm2, %v457_v37  ;;  %v532_v43 = vmax.f32 %v507_v18, %v509_v39 }
  0xde   : > { %v602_v41 = vmax.f32 %v579_v38, %v556_v40 }
  0xdf   : > { %v647_v42 = vld [vmem:[#allocation3 + $0x20] sm:$0xff]  ;;  %v580_v48 = vmax.f32 %v532_v43, %v555_v30 }
  0xe0   : > { %2035 = vmatmul.msk.f32.vlgmr.msra.gmra.mxu1 %vm474_vm2, %v647_v42  ;;  %2054 = vmatmul.msk.f32.gmra.mxu2 %vm474_vm2, %v647_v42  ;;  %625 = vst.msk [vmem:[#allocation3 + $0x28] sm:$0xff] %vm474_vm2, %v602_v41  ;;  %v400_v44 = vpop.f32.mrf.mxu0  ;;  %v1262_v56 = vld [vmem:[#allocation3 + $0x1c] sm:$0xff] }
  0xe1   : > { %v401_v45 = vadd.f32 %v2364_v21, %v400_v44 }
  0xe3   : > { %v458_v47 = vmax.f32 %v401_v45, 0.0  ;;  %2132 = vmatmul.msk.f32.gmra.mxu0 %vm474_vm2, %v1261_v46 }
  0xe4   : > { %v510_v49 = vld [vmem:[#allocation2 + $0x48] sm:$0xff] }
  0xe5   : > { %v557_v50 = vld [vmem:[#allocation2 + $0x41] sm:$0xff]  ;;  %485 = vst.msk [vmem:[#allocation2 + $0x50] sm:$0xff] %vm474_vm2, %v458_v47  ;;  %v533_v53 = vmax.f32 %v508_v29, %v510_v49 }
  0xe6   : > { %v603_v51 = vmax.f32 %v580_v48, %v557_v50 }
  0xe7   : > { %v648_v52 = vld [vmem:[#allocation3 + $0x28] sm:$0xff]  ;;  %v581_v58 = vmax.f32 %v533_v53, %v556_v40 }
  0xe8   : > { %2036 = vmatmul.msk.f32.gmra.mxu1 %vm474_vm2, %v648_v52  ;;  %2055 = vmatmul.msk.f32.gmra.mxu2 %vm474_vm2, %v648_v52  ;;  %626 = vst.msk [vmem:[#allocation3 + $0x30] sm:$0xff] %vm474_vm2, %v603_v51  ;;  %v403_v54 = vpop.f32.mrf.mxu0  ;;  %v2445_v2 = vld [vmem:[#allocation3 + $0x24] sm:$0xff] }
  0xe9   : > { %v404_v55 = vadd.f32 %v2364_v21, %v403_v54  ;;  %v2510_v53 = vld [vmem:[#allocation3 + $0x22] sm:$0xff] }
  0xeb   : > { %v459_v57 = vmax.f32 %v404_v55, 0.0  ;;  %2133 = vmatmul.msk.f32.gmra.mxu0 %vm474_vm2, %v1262_v56 }
  0xec   : > { %v511_v59 = vld [vmem:[#allocation2 + $0x50] sm:$0xff] }
  0xed   : > { %v558_v60 = vld [vmem:[#allocation2 + $0x49] sm:$0xff]  ;;  %486 = vst.msk [vmem:[#allocation2 + $0x58] sm:$0xff] %vm474_vm2, %v459_v57  ;;  %v534_v63 = vmax.f32 %v509_v39, %v511_v59 }
  0xee   : > { %v604_v61 = vmax.f32 %v581_v58, %v558_v60 }
  0xef   : > { %v649_v62 = vld [vmem:[#allocation3 + $0x30] sm:$0xff]  ;;  %v582_v4 = vmax.f32 %v534_v63, %v557_v50 }
  0xf0   : > { %2037 = vmatmul.msk.f32.gmra.mxu1 %vm474_vm2, %v649_v62  ;;  %2056 = vmatmul.msk.f32.gmra.mxu2 %vm474_vm2, %v649_v62  ;;  %627 = vst.msk [vmem:[#allocation3 + $0x38] sm:$0xff] %vm474_vm2, %v604_v61  ;;  %v406_v0 = vpop.f32.mrf.mxu0  ;;  %v2458_v13 = vld [vmem:[#allocation3 + $0x2c] sm:$0xff] }
  0xf1   : > { %v407_v1 = vadd.f32 %v2364_v21, %v406_v0  ;;  %v2525_v0 = vld [vmem:[#allocation3 + $0x2a] sm:$0xff] }
  0xf3   : > { %v460_v3 = vmax.f32 %v407_v1, 0.0  ;;  %2134 = vmatmul.msk.f32.gmra.mxu0 %vm474_vm2, %v2445_v2 }
  0xf4   : > { %v512_v5 = vld [vmem:[#allocation2 + $0x58] sm:$0xff] }
  0xf5   : > { %v559_v6 = vld [vmem:[#allocation2 + $0x51] sm:$0xff]  ;;  %487 = vst.msk [vmem:[#allocation2 + $0x60] sm:$0xff] %vm474_vm2, %v460_v3  ;;  %v535_v10 = vmax.f32 %v510_v49, %v512_v5 }
  0xf6   : > { %v605_v7 = vmax.f32 %v582_v4, %v559_v6 }
  0xf7   : > { %v650_v9 = vld [vmem:[#allocation3 + $0x38] sm:$0xff]  ;;  %v583_v15 = vmax.f32 %v535_v10, %v558_v60 }
  0xf8   : > { %2038 = vmatmul.msk.f32.gmra.mxu1 %vm474_vm2, %v650_v9  ;;  %2057 = vmatmul.msk.f32.gmra.mxu2 %vm474_vm2, %v650_v9  ;;  %628 = vst.msk [vmem:[#allocation3 + $0x40] sm:$0xff] %vm474_vm2, %v605_v7  ;;  %v409_v11 = vpop.f32.mrf.mxu0  ;;  %v2473_v25 = vld [vmem:[#allocation3 + $0x34] sm:$0xff] }
  0xf9   : > { %v410_v12 = vadd.f32 %v2364_v21, %v409_v11 }
  0xfb   : > { %v461_v14 = vmax.f32 %v410_v12, 0.0  ;;  %2135 = vmatmul.msk.f32.gmra.mxu0 %vm474_vm2, %v2458_v13  ;;  %v2540_v12 = vld [vmem:[#allocation3 + $0x32] sm:$0xff] }
  0xfc   : > { %v513_v16 = vld [vmem:[#allocation2 + $0x60] sm:$0xff] }
  0xfd   : > { %v560_v17 = vld [vmem:[#allocation2 + $0x59] sm:$0xff]  ;;  %488 = vst.msk [vmem:[#allocation2 + $0x68] sm:$0xff] %vm474_vm2, %v461_v14  ;;  %v536_v22 = vmax.f32 %v511_v59, %v513_v16 }
  0xfe   : > { %v606_v18 = vmax.f32 %v583_v15, %v560_v17 }
  0xff   : > { %v2463_v19 = vld [vmem:[#allocation3 + $0x40] sm:$0xff]  ;;  %v584_v27 = vmax.f32 %v536_v22, %v559_v6 }
 0x100   : > { %2039 = vmatmul.msk.f32.gmra.mxu1 %vm474_vm2, %v2463_v19  ;;  %2058 = vmatmul.msk.f32.gmra.mxu2 %vm474_vm2, %v2463_v19  ;;  %629 = vst.msk [vmem:[#allocation3 + $0x48] sm:$0xff] %vm474_vm2, %v606_v18  ;;  %v412_v23 = vpop.f32.mrf.mxu0  ;;  %v2490_v36 = vld [vmem:[#allocation3 + $0x3c] sm:$0xff] }
 0x101   : > { %v413_v24 = vadd.f32 %v2364_v21, %v412_v23 }
 0x103   : > { %v462_v26 = vmax.f32 %v413_v24, 0.0  ;;  %2136 = vmatmul.msk.f32.gmra.mxu0 %vm474_vm2, %v2473_v25 }
 0x104   : > { %v514_v28 = vld [vmem:[#allocation2 + $0x68] sm:$0xff] }
 0x105   : > { %v561_v29 = vld [vmem:[#allocation2 + $0x61] sm:$0xff]  ;;  %489 = vst.msk [vmem:[#allocation2 + $0x70] sm:$0xff] %vm474_vm2, %v462_v26  ;;  %v537_v33 = vmax.f32 %v512_v5, %v514_v28  ;;  %v442_v26 = vpop.f32.mrf.mxu3 }
 0x106   : > { %v607_v30 = vmax.f32 %v584_v27, %v561_v29 }
 0x107   : > { %v2481_v32 = vld [vmem:[#allocation3 + $0x48] sm:$0xff]  ;;  %v585_v38 = vmax.f32 %v537_v33, %v560_v17 }
 0x108   : > { %2040 = vmatmul.msk.f32.gmra.mxu1 %vm474_vm2, %v2481_v32  ;;  %2059 = vmatmul.msk.f32.gmra.mxu2 %vm474_vm2, %v2481_v32  ;;  %630 = vst.msk [vmem:[#allocation3 + $0x50] sm:$0xff] %vm474_vm2, %v607_v30  ;;  %v415_v34 = vpop.f32.mrf.mxu0  ;;  %v2503_v46 = vld [vmem:[#allocation3 + $0x44] sm:$0xff] }
 0x109   : > { %v416_v35 = vadd.f32 %v2364_v21, %v415_v34 }
 0x10b   : > { %v463_v37 = vmax.f32 %v416_v35, 0.0  ;;  %2137 = vmatmul.msk.f32.gmra.mxu0 %vm474_vm2, %v2490_v36 }
 0x10c   : > { %v515_v39 = vld [vmem:[#allocation2 + $0x70] sm:$0xff] }
 0x10d   : > { %v562_v40 = vld [vmem:[#allocation2 + $0x69] sm:$0xff]  ;;  %490 = vst.msk [vmem:[#allocation2 + $0x78] sm:$0xff] %vm474_vm2, %v463_v37  ;;  %v538_v43 = vmax.f32 %v513_v16, %v515_v39 }
 0x10e   : > { %v608_v41 = vmax.f32 %v585_v38, %v562_v40 }
 0x10f   : > { %v2495_v42 = vld [vmem:[#allocation3 + $0x50] sm:$0xff]  ;;  %v586_v48 = vmax.f32 %v538_v43, %v561_v29  ;;  %v443_v29 = vadd.f32 %v2364_v21, %v442_v26  ;;  %v2064_v43 = vld [vmem:[%s3120_s2 + $0x18] sm:$0xf] }
 0x110   : > { %2041 = vmatmul.msk.f32.gmra.mxu1 %vm474_vm2, %v2495_v42  ;;  %2060 = vmatmul.msk.f32.gmra.mxu2 %vm474_vm2, %v2495_v42  ;;  %631 = vst.msk [vmem:[#allocation3 + $0x58] sm:$0xff] %vm474_vm2, %v608_v41  ;;  %v418_v44 = vpop.f32.mrf.mxu0  ;;  %v2518_v57 = vld [vmem:[#allocation3 + $0x4c] sm:$0xff] }
 0x111   : > { %v419_v45 = vadd.f32 %v2364_v21, %v418_v44  ;;  %v472_v33 = vmax.f32 %v443_v29, 0.0 }
 0x113   : > { %v464_v47 = vmax.f32 %v419_v45, 0.0  ;;  %2138 = vmatmul.msk.f32.gmra.mxu0 %vm474_vm2, %v2503_v46  ;;  %499 = vst.msk [vmem:[#allocation2 + $0xc0] sm:$0xff] %vm474_vm2, %v472_v33  ;;  %v937_v45 = vld [vmem:[#allocation3 + $0x2] sm:$0xff]  ;;  %v2160_v33 = vld [vmem:[%s3120_s2 + $0x20] sm:$0xf] }
 0x114   : > { %v516_v49 = vld [vmem:[#allocation2 + $0x78] sm:$0xff]  ;;  %2161 = vmatpush.msk.msra.mxu2 %vm710_vm3, %v2160_v33 }
 0x115   : > { %v563_v50 = vld [vmem:[#allocation2 + $0x71] sm:$0xff]  ;;  %491 = vst.msk [vmem:[#allocation2 + $0x80] sm:$0xff] %vm474_vm2, %v464_v47  ;;  %v539_v54 = vmax.f32 %v514_v28, %v516_v49 }
 0x116   : > { %v609_v51 = vmax.f32 %v586_v48, %v563_v50  ;;  %v2555_v28 = vld [vmem:[#allocation3 + $0x3a] sm:$0xff]  ;;  %v2578_v48 = vld [vmem:[#allocation3 + $0x42] sm:$0xff] }
 0x117   : > { %v2508_v52 = vld [vmem:[#allocation3 + $0x58] sm:$0xff]  ;;  %v587_v59 = vmax.f32 %v539_v54, %v562_v40 }
 0x118   : > { %2042 = vmatmul.msk.f32.gmra.mxu1 %vm474_vm2, %v2508_v52  ;;  %2098 = vmatmul.msk.f32.vlgmr.msrb.gmra.mxu2 %vm474_vm2, %v2510_v53  ;;  %632 = vst.msk [vmem:[#allocation3 + $0x60] sm:$0xff] %vm474_vm2, %v609_v51  ;;  %v421_v55 = vpop.f32.mrf.mxu0  ;;  %v2533_v5 = vld [vmem:[#allocation3 + $0x54] sm:$0xff] }
 0x119   : > { %v422_v56 = vadd.f32 %v2364_v21, %v421_v55 }
 0x11b   : > { %v465_v58 = vmax.f32 %v422_v56, 0.0  ;;  %2139 = vmatmul.msk.f32.gmra.mxu0 %vm474_vm2, %v2518_v57 }
 0x11c   : > { %v517_v60 = vld [vmem:[#allocation2 + $0x80] sm:$0xff] }
 0x11d   : > { %v564_v61 = vld [vmem:[#allocation2 + $0x79] sm:$0xff]  ;;  %492 = vst.msk [vmem:[#allocation2 + $0x88] sm:$0xff] %vm474_vm2, %v465_v58  ;;  %v540_v1 = vmax.f32 %v515_v39, %v517_v60 }
 0x11e   : > { %v610_v62 = vmax.f32 %v587_v59, %v564_v61 }
 0x11f   : > { %v2523_v63 = vld [vmem:[#allocation3 + $0x60] sm:$0xff]  ;;  %v588_v7 = vmax.f32 %v540_v1, %v563_v50  ;;  %v2595_v1 = vld [vmem:[#allocation3 + $0x4a] sm:$0xff] }
 0x120   : > { %2043 = vmatmul.msk.f32.gmra.mxu1 %vm474_vm2, %v2523_v63  ;;  %2099 = vmatmul.msk.f32.gmra.mxu2 %vm474_vm2, %v2525_v0  ;;  %633 = vst.msk [vmem:[#allocation3 + $0x68] sm:$0xff] %vm474_vm2, %v610_v62  ;;  %v424_v3 = vpop.f32.mrf.mxu0  ;;  %v2548_v17 = vld [vmem:[#allocation3 + $0x5c] sm:$0xff] }
 0x121   : > { %v425_v4 = vadd.f32 %v2364_v21, %v424_v3 }
 0x123   : > { %v466_v6 = vmax.f32 %v425_v4, 0.0  ;;  %2140 = vmatmul.msk.f32.gmra.mxu0 %vm474_vm2, %v2533_v5 }
 0x124   : > { %v518_v8 = vld [vmem:[#allocation2 + $0x88] sm:$0xff] }
 0x125   : > { %v565_v9 = vld [vmem:[#allocation2 + $0x81] sm:$0xff]  ;;  %493 = vst.msk [vmem:[#allocation2 + $0x90] sm:$0xff] %vm474_vm2, %v466_v6  ;;  %v541_v14 = vmax.f32 %v516_v49, %v518_v8 }
 0x126   : > { %v611_v10 = vmax.f32 %v588_v7, %v565_v9 }
 0x127   : > { %v2538_v11 = vld [vmem:[#allocation3 + $0x68] sm:$0xff]  ;;  %v589_v18 = vmax.f32 %v541_v14, %v564_v61 }
 0x128   : > { %2044 = vmatmul.msk.f32.gmra.mxu1 %vm474_vm2, %v2538_v11  ;;  %2100 = vmatmul.msk.f32.gmra.mxu2 %vm474_vm2, %v2540_v12  ;;  %634 = vst.msk [vmem:[#allocation3 + $0x70] sm:$0xff] %vm474_vm2, %v611_v10  ;;  %v427_v15 = vpop.f32.mrf.mxu0  ;;  %v2564_v35 = vld [vmem:[#allocation3 + $0x64] sm:$0xff] }
 0x129   : > { %v428_v16 = vadd.f32 %v2364_v21, %v427_v15  ;;  %v938_v61 = vld [vmem:[#allocation3 + $0xa] sm:$0xff]  ;;  %v939_v15 = vld [vmem:[#allocation3 + $0x12] sm:$0xff] }
 0x12b   : > { %v467_v20 = vmax.f32 %v428_v16, 0.0  ;;  %2141 = vmatmul.msk.f32.gmra.mxu0 %vm474_vm2, %v2548_v17 }
 0x12c   : > { %v519_v22 = vld [vmem:[#allocation2 + $0x90] sm:$0xff] }
 0x12d   : > { %v566_v23 = vld [vmem:[#allocation2 + $0x89] sm:$0xff]  ;;  %494 = vst.msk [vmem:[#allocation2 + $0x98] sm:$0xff] %vm474_vm2, %v467_v20  ;;  %v542_v30 = vmax.f32 %v517_v60, %v519_v22 }
 0x12e   : > { %v612_v24 = vmax.f32 %v589_v18, %v566_v23  ;;  %v2608_v18 = vld [vmem:[#allocation3 + $0x52] sm:$0xff] }
 0x12f   : > { %v2553_v27 = vld [vmem:[#allocation3 + $0x70] sm:$0xff]  ;;  %v590_v38 = vmax.f32 %v542_v30, %v565_v9 }
 0x130   : > { %635 = vst.msk [vmem:[#allocation3 + $0x78] sm:$0xff] %vm474_vm2, %v612_v24  ;;  %2045 = vmatmul.msk.f32.gmra.mxu1 %vm474_vm2, %v2553_v27  ;;  %2101 = vmatmul.msk.f32.gmra.mxu2 %vm474_vm2, %v2555_v28  ;;  %v430_v31 = vpop.f32.mrf.mxu0  ;;  %v2585_v51 = vld [vmem:[#allocation3 + $0x6c] sm:$0xff] }
 0x131   : > { %v431_v34 = vadd.f32 %v2364_v21, %v430_v31  ;;  %v2112_v31 = vld [vmem:[%s3120_s2 + $0x1c] sm:$0xf] }
 0x133   : > { %v468_v37 = vmax.f32 %v431_v34, 0.0  ;;  %2142 = vmatmul.msk.f32.gmra.mxu0 %vm474_vm2, %v2564_v35 }
 0x134   : > { %v520_v39 = vld [vmem:[#allocation2 + $0x98] sm:$0xff] }
 0x135   : > { %v567_v40 = vld [vmem:[#allocation2 + $0x91] sm:$0xff]  ;;  %495 = vst.msk [vmem:[#allocation2 + $0xa0] sm:$0xff] %vm474_vm2, %v468_v37  ;;  %v543_v47 = vmax.f32 %v518_v8, %v520_v39 }
 0x136   : > { %v613_v41 = vmax.f32 %v590_v38, %v567_v40  ;;  %v940_v37 = vld [vmem:[#allocation3 + $0x1a] sm:$0xff] }
 0x137   : > { %v2573_v44 = vld [vmem:[#allocation3 + $0x78] sm:$0xff]  ;;  %v591_v55 = vmax.f32 %v543_v47, %v566_v23 }
 0x138   : > { %2046 = vmatmul.msk.f32.vlgmr.msrb.gmra.mxu3 %vm474_vm2, %v2573_v44  ;;  %2082 = vmatmul.msk.f32.vlgmr.msrb.gmra.mxu1 %vm474_vm2, %v937_v45  ;;  %636 = vst.msk [vmem:[#allocation3 + $0x80] sm:$0xff] %vm474_vm2, %v613_v41  ;;  %v433_v49 = vpop.f32.mrf.mxu0 }
 0x139   : > { %2102 = vmatmul.msk.f32.gmra.mxu2 %vm474_vm2, %v2578_v48  ;;  %2065 = vmatpush.msk.msrb.mxu3 %vm710_vm3, %v2064_v43  ;;  %v434_v50 = vadd.f32 %v2364_v21, %v433_v49 }
 0x13b   : > { %v469_v54 = vmax.f32 %v434_v50, 0.0  ;;  %2143 = vmatmul.msk.f32.gmra.mxu0 %vm474_vm2, %v2585_v51 }
 0x13c   : > { %v521_v56 = vld [vmem:[#allocation2 + $0xa0] sm:$0xff] }
 0x13d   : > { %v568_v58 = vld [vmem:[#allocation2 + $0x99] sm:$0xff]  ;;  %496 = vst.msk [vmem:[#allocation2 + $0xa8] sm:$0xff] %vm474_vm2, %v469_v54  ;;  %v544_v62 = vmax.f32 %v519_v22, %v521_v56 }
 0x13e   : > { %v614_v59 = vmax.f32 %v591_v55, %v568_v58  ;;  %v2645_v55 = vld [vmem:[#allocation3 + $0x62] sm:$0xff] }
 0x13f   : > { %v2590_v60 = vld [vmem:[#allocation3 + $0x80] sm:$0xff]  ;;  %v592_v6 = vmax.f32 %v544_v62, %v567_v40 }
 0x140   : > { %2047 = vmatmul.msk.f32.gmra.mxu3 %vm474_vm2, %v2590_v60  ;;  %2083 = vmatmul.msk.f32.gmra.mxu1 %vm474_vm2, %v938_v61  ;;  %637 = vst.msk [vmem:[#allocation3 + $0x88] sm:$0xff] %vm474_vm2, %v614_v59  ;;  %v436_v3 = vpop.f32.mrf.mxu0  ;;  %v2144_v40 = vld [vmem:[%s3120_s2 + $0x14] sm:$0xf] }
 0x141   : > { %2103 = vmatmul.msk.f32.gmra.mxu2 %vm474_vm2, %v2595_v1  ;;  %v437_v4 = vadd.f32 %v2364_v21, %v436_v3  ;;  %2145 = vmatpush.msk.msra.mxu1 %vm710_vm3, %v2144_v40  ;;  %v2669_v3 = vld [vmem:[#allocation3 + $0x72] sm:$0xff] }
 0x143   : > { %v470_v7 = vmax.f32 %v437_v4, 0.0  ;;  %v2615_v30 = vpop.f32.mrf.mxu2 }
 0x144   : > { %v522_v8 = vld [vmem:[#allocation2 + $0xa8] sm:$0xff] }
 0x145   : > { %v569_v9 = vld [vmem:[#allocation2 + $0xa1] sm:$0xff]  ;;  %497 = vst.msk [vmem:[#allocation2 + $0xb0] sm:$0xff] %vm474_vm2, %v470_v7  ;;  %v545_v16 = vmax.f32 %v520_v39, %v522_v8  ;;  %v2629_v39 = vld [vmem:[#allocation3 + $0x5a] sm:$0xff] }
 0x146   : > { %v615_v10 = vmax.f32 %v592_v6, %v569_v9  ;;  %v2681_v6 = vld [vmem:[#allocation3 + $0x7a] sm:$0xff] }
 0x147   : > { %v2602_v14 = vld [vmem:[#allocation3 + $0x88] sm:$0xff]  ;;  %v593_v24 = vmax.f32 %v545_v16, %v568_v58 }
 0x148   : > { %638 = vst.msk [vmem:[#allocation3 + $0x90] sm:$0xff] %vm474_vm2, %v615_v10  ;;  %2048 = vmatmul.msk.f32.gmra.mxu3 %vm474_vm2, %v2602_v14  ;;  %2084 = vmatmul.msk.f32.gmra.mxu1 %vm474_vm2, %v939_v15  ;;  %v439_v20 = vpop.f32.mrf.mxu0  ;;  %v2693_v7 = vld [vmem:[#allocation3 + $0x82] sm:$0xff]  ;;  %v525_v15 = vld [vmem:[#allocation2 + $0xc0] sm:$0xff] }
 0x149   : > { %2104 = vmatmul.msk.f32.gmra.mxu2 %vm474_vm2, %v2608_v18  ;;  %v440_v22 = vadd.f32 %v2364_v21, %v439_v20 }
 0x14b   : > { %v471_v23 = vmax.f32 %v440_v22, 0.0  ;;  %v2639_v54 = vpop.f32.mrf.mxu2 }
 0x14c   : > { %v2613_v26 = vld [vmem:[#allocation2 + $0xb0] sm:$0xff] }
 0x14d   : > { %v570_v29 = vld [vmem:[#allocation2 + $0xa9] sm:$0xff]  ;;  %498 = vst.msk [vmem:[#allocation2 + $0xb8] sm:$0xff] %vm474_vm2, %v471_v23  ;;  %v546_v38 = vmax.f32 %v521_v56, %v2613_v26 }
 0x14e   : > { %v616_v34 = vmax.f32 %v593_v24, %v570_v29 }
 0x14f   : > { %v594_v41 = vmax.f32 %v546_v38, %v569_v9  ;;  %v2783_v38 = vld [vmem:[#allocation3 + $0x7c] sm:$0xff] }
 0x150   : > { %2061 = vmatmul.msk.f32.vlgmr.msra.gmra.mxu3 %vm474_vm2, %v2508_v52  ;;  %2085 = vmatmul.msk.f32.gmra.mxu1 %vm474_vm2, %v940_v37  ;;  %639 = vst.msk [vmem:[#allocation3 + $0x98] sm:$0xff] %vm474_vm2, %v616_v34 }
 0x151   : > { %2105 = vmatmul.msk.f32.gmra.mxu2 %vm474_vm2, %v2629_v39  ;;  %2113 = vmatpush.msk.msra.mxu3 %vm710_vm3, %v2112_v31 }
 0x153   : > { %v2661_v61 = vpop.f32.mrf.mxu2 }
 0x154   : > { %v524_v43 = vld [vmem:[#allocation2 + $0xb8] sm:$0xff] }
 0x155   : > { %v571_v45 = vld [vmem:[#allocation2 + $0xb1] sm:$0xff]  ;;  %v547_v47 = vmax.f32 %v522_v8, %v524_v43  ;;  %v572_v50 = vld [vmem:[#allocation2 + $0xb9] sm:$0xff] }
 0x156   : > { %v617_v49 = vmax.f32 %v594_v41, %v571_v45  ;;  %v2705_v8 = vld [vmem:[#allocation3 + $0x8a] sm:$0xff] }
 0x157   : > { %v595_v56 = vmax.f32 %v547_v47, %v570_v29 }
 0x158   : > { %2062 = vmatmul.msk.f32.gmra.mxu3 %vm474_vm2, %v2523_v63  ;;  %2086 = vmatmul.msk.f32.gmra.mxu1 %vm474_vm2, %v2510_v53  ;;  %640 = vst.msk [vmem:[#allocation3 + $0xa0] sm:$0xff] %vm474_vm2, %v617_v49  ;;  %v2657_v53 = vld [vmem:[#allocation3 + $0x6a] sm:$0xff] }
 0x159   : > { %2106 = vmatmul.msk.f32.gmra.mxu2 %vm474_vm2, %v2645_v55  ;;  %v618_v58 = vmax.f32 %v595_v56, %v572_v50  ;;  %v2801_v56 = vld [vmem:[#allocation3 + $0x8c] sm:$0xff] }
 0x15b   : > { %641 = vst.msk [vmem:[#allocation3 + $0xa8] sm:$0xff] %vm474_vm2, %v618_v58 }
 0x15d   : > { %v2651_v59 = vpop.f32.mrf.mxu1 }
 0x15f   : > { %v663_v43 = vld [vmem:[#allocation3 + $0xa0] sm:$0xff] }
 0x160   : > { %2063 = vmatmul.msk.f32.gmra.mxu3 %vm474_vm2, %v2538_v11  ;;  %2087 = vmatmul.msk.f32.gmra.mxu1 %vm474_vm2, %v2525_v0  ;;  %v2673_v0 = vpop.f32.mrf.mxu2 }
 0x161   : > { %2107 = vmatmul.msk.f32.gmra.mxu2 %vm474_vm2, %v2657_v53 }
 0x162   : > { %v664_v49 = vld [vmem:[#allocation3 + $0xa8] sm:$0xff] }
 0x165   : > { %v2663_v62 = vpop.f32.mrf.mxu1 }
 0x168   : > { %2066 = vmatmul.msk.f32.vlgmr.msrb.gmra.mxu3 %vm474_vm2, %v2463_v19  ;;  %2088 = vmatmul.msk.f32.gmra.mxu1 %vm474_vm2, %v2540_v12  ;;  %v2687_v12 = vpop.f32.mrf.mxu2 }
 0x169   : > { %2108 = vmatmul.msk.f32.gmra.mxu2 %vm474_vm2, %v2669_v3 }
 0x16d   : > { %v2675_v4 = vpop.f32.mrf.mxu1 }
 0x170   : > { %2067 = vmatmul.msk.f32.gmra.mxu3 %vm474_vm2, %v2481_v32  ;;  %2089 = vmatmul.msk.f32.gmra.mxu1 %vm474_vm2, %v2555_v28  ;;  %v2699_v28 = vpop.f32.mrf.mxu2 }
 0x171   : > { %2109 = vmatmul.msk.f32.gmra.mxu2 %vm474_vm2, %v2681_v6 }
 0x175   : > { %v2685_v19 = vpop.f32.mrf.mxu1 }
 0x178   : > { %2068 = vmatmul.msk.f32.gmra.mxu3 %vm474_vm2, %v2495_v42  ;;  %2090 = vmatmul.msk.f32.gmra.mxu1 %vm474_vm2, %v2578_v48  ;;  %v445_v42 = vpop.f32.mrf.mxu3  ;;  %v2720_v20 = vpop.f32.mrf.mxu2 }
 0x179   : > { %2110 = vmatmul.msk.f32.gmra.mxu2 %vm474_vm2, %v2693_v7  ;;  %v446_v10 = vadd.f32 %v2364_v21, %v445_v42 }
 0x17b   : > { %v473_v16 = vmax.f32 %v446_v10, 0.0  ;;  %v1277_v10 = vld [vmem:[#allocation3 + $0x94] sm:$0xff] }
 0x17d   : > { %v2697_v32 = vpop.f32.mrf.mxu1  ;;  %500 = vst.msk [vmem:[#allocation2 + $0xc8] sm:$0xff] %vm474_vm2, %v473_v16 }
 0x180   : > { %2069 = vmatmul.msk.f32.gmra.mxu3 %vm474_vm2, %v2508_v52  ;;  %2091 = vmatmul.msk.f32.gmra.mxu1 %vm474_vm2, %v2595_v1  ;;  %v548_v52 = vmax.f32 %v2613_v26, %v525_v15  ;;  %v2731_v24 = vpop.f32.mrf.mxu2 }
 0x181   : > { %2111 = vmatmul.msk.f32.gmra.mxu2 %vm474_vm2, %v2705_v8 }
 0x182   : > { %v596_v21 = vmax.f32 %v548_v52, %v571_v45  ;;  %v2792_v45 = vld [vmem:[#allocation3 + $0x84] sm:$0xff]  ;;  %v1278_v52 = vld [vmem:[#allocation3 + $0x9c] sm:$0xff] }
 0x185   : > { %v2709_v9 = vpop.f32.mrf.mxu1 }
 0x188   : > { %2070 = vmatmul.msk.f32.gmra.mxu3 %vm474_vm2, %v2523_v63  ;;  %2092 = vmatmul.msk.f32.gmra.mxu1 %vm474_vm2, %v2608_v18  ;;  %v573_v63 = vld [vmem:[#allocation2 + $0xc1] sm:$0xff]  ;;  %v2743_v29 = vpop.f32.mrf.mxu2 }
 0x189   : > { %2162 = vmatmul.msk.f32.vlgmr.msra.gmra.mxu2 %vm474_vm2, %v2503_v46  ;;  %v619_v23 = vmax.f32 %v596_v21, %v573_v63 }
 0x18b   : > { %642 = vst.msk [vmem:[#allocation3 + $0xb0] sm:$0xff] %vm474_vm2, %v619_v23  ;;  %v1279_v23 = vld [vmem:[#allocation3 + $0xa4] sm:$0xff] }
 0x18d   : > { %v2722_v22 = vpop.f32.mrf.mxu1 }
 0x190   : > { %2071 = vmatmul.msk.f32.gmra.mxu3 %vm474_vm2, %v2538_v11  ;;  %2093 = vmatmul.msk.f32.gmra.mxu1 %vm474_vm2, %v2629_v39  ;;  %v2753_v31 = vpop.f32.mrf.mxu2 }
 0x191   : > { %2163 = vmatmul.msk.f32.gmra.mxu2 %vm474_vm2, %v2518_v57 }
 0x195   : > { %v2733_v26 = vpop.f32.mrf.mxu1 }
 0x198   : > { %2072 = vmatmul.msk.f32.gmra.mxu3 %vm474_vm2, %v2553_v27  ;;  %2094 = vmatmul.msk.f32.gmra.mxu1 %vm474_vm2, %v2645_v55  ;;  %v2769_v33 = vpop.f32.mrf.mxu2 }
 0x199   : > { %2164 = vmatmul.msk.f32.gmra.mxu2 %vm474_vm2, %v2533_v5 }
 0x19d   : > { %v2741_v11 = vpop.f32.mrf.mxu1 }
 0x1a0   : > { %2073 = vmatmul.msk.f32.gmra.mxu3 %vm474_vm2, %v2573_v44  ;;  %2095 = vmatmul.msk.f32.gmra.mxu1 %vm474_vm2, %v2657_v53  ;;  %v2778_v37 = vpop.f32.mrf.mxu2 }
 0x1a1   : > { %2165 = vmatmul.msk.f32.gmra.mxu2 %vm474_vm2, %v2548_v17 }
 0x1a5   : > { %v2751_v27 = vpop.f32.mrf.mxu1 }
 0x1a8   : > { %2074 = vmatmul.msk.f32.gmra.mxu3 %vm474_vm2, %v2590_v60  ;;  %2146 = vmatmul.msk.f32.vlgmr.msra.gmra.mxu1 %vm474_vm2, %v2445_v2  ;;  %v661_v60 = vld [vmem:[#allocation3 + $0x90] sm:$0xff]  ;;  %v2787_v41 = vpop.f32.mrf.mxu2 }
 0x1a9   : > { %2166 = vmatmul.msk.f32.gmra.mxu2 %vm474_vm2, %v2564_v35  ;;  %v2774_v2 = vld [vmem:[#allocation3 + $0x74] sm:$0xff] }
 0x1ad   : > { %v2761_v44 = vpop.f32.mrf.mxu1 }
 0x1b0   : > { %2075 = vmatmul.msk.f32.gmra.mxu3 %vm474_vm2, %v2602_v14  ;;  %2147 = vmatmul.msk.f32.gmra.mxu1 %vm474_vm2, %v2458_v13  ;;  %v662_v13 = vld [vmem:[#allocation3 + $0x98] sm:$0xff]  ;;  %v2796_v50 = vpop.f32.mrf.mxu2 }
 0x1b1   : > { %2167 = vmatmul.msk.f32.gmra.mxu2 %vm474_vm2, %v2585_v51 }
 0x1b5   : > { %v1023_v14 = vpop.f32.mrf.mxu1 }
 0x1b8   : > { %2076 = vmatmul.msk.f32.gmra.mxu3 %vm474_vm2, %v661_v60  ;;  %2148 = vmatmul.msk.f32.gmra.mxu1 %vm474_vm2, %v2473_v25  ;;  %v2812_v15 = vpop.f32.mrf.mxu2 }
 0x1b9   : > { %2168 = vmatmul.msk.f32.gmra.mxu2 %vm474_vm2, %v2774_v2 }
 0x1bb   : > { %v764_v34 = vpop.f32.mrf.mxu3 }
 0x1bd   : > { %v1026_v40 = vpop.f32.mrf.mxu1 }
 0x1c0   : > { %2077 = vmatmul.msk.f32.gmra.mxu3 %vm474_vm2, %v662_v13  ;;  %2149 = vmatmul.msk.f32.gmra.mxu1 %vm474_vm2, %v2490_v36 }
 0x1c1   : > { %2169 = vmatmul.msk.f32.gmra.mxu2 %vm474_vm2, %v2783_v38 }
 0x1c3   : > { %v767_v25 = vpop.f32.mrf.mxu3 }
 0x1c5   : > { %v1029_v47 = vpop.f32.mrf.mxu1 }
 0x1c8   : > { %2078 = vmatmul.msk.f32.gmra.mxu3 %vm474_vm2, %v663_v43  ;;  %2150 = vmatmul.msk.f32.gmra.mxu1 %vm474_vm2, %v2503_v46 }
 0x1c9   : > { %2170 = vmatmul.msk.f32.gmra.mxu2 %vm474_vm2, %v2792_v45 }
 0x1cb   : > { %v770_v36 = vpop.f32.mrf.mxu3 }
 0x1cd   : > { %v1032_v42 = vpop.f32.mrf.mxu1 }
 0x1d0   : > { %2079 = vmatmul.msk.f32.gmra.mxu3 %vm474_vm2, %v664_v49  ;;  %2151 = vmatmul.msk.f32.gmra.mxu1 %vm474_vm2, %v2518_v57 }
 0x1d1   : > { %2171 = vmatmul.msk.f32.gmra.mxu2 %vm474_vm2, %v2801_v56 }
 0x1d3   : > { %v838_v46 = vpop.f32.mrf.mxu3 }
 0x1d4   : > { %v2805_v58 = vadd.f32 %v838_v46, %v764_v34 }
 0x1d8   : > { %2114 = vmatmul.msk.f32.vlgmr.msra.gmra.mxu3 %vm474_vm2, %v2578_v48  ;;  %2152 = vmatmul.msk.f32.gmra.mxu1 %vm474_vm2, %v2533_v5  ;;  %v1035_v48 = vpop.f32.mrf.mxu1  ;;  %v2821_v5 = vpop.f32.mrf.mxu2 }
 0x1d9   : > { %2172 = vmatmul.msk.f32.gmra.mxu2 %vm474_vm2, %v1277_v10 }
 0x1db   : > { %v841_v57 = vpop.f32.mrf.mxu3 }
 0x1dc   : > { %v2814_v16 = vadd.f32 %v841_v57, %v767_v25  ;;  %v824_v57 = vadd.f32 %v2720_v20, %v2722_v22  ;;  %v830_v20 = vadd.f32 %v2743_v29, %v2741_v11  ;;  %v232_v11 = vld [vmem:[%s3121_s3] sm:$0x1]  ;;  %v957_v29 = vld [vmem:[#allocation3 + $0xa2] sm:$0xff] }
 0x1dd   : > { %235 = vst [vmem:[#allocation6] sm:$0x1] %v232_v11 }
 0x1e0   : > { %2115 = vmatmul.msk.f32.gmra.mxu3 %vm474_vm2, %v2595_v1  ;;  %2153 = vmatmul.msk.f32.gmra.mxu1 %vm474_vm2, %v2548_v17  ;;  %v806_v17 = vadd.f32 %v2615_v30, %v2651_v59  ;;  %v1038_v60 = vpop.f32.mrf.mxu1  ;;  %v2832_v13 = vpop.f32.mrf.mxu2 }
 0x1e1   : > { %2173 = vmatmul.msk.f32.gmra.mxu2 %vm474_vm2, %v1278_v52 }
 0x1e3   : > { %v844_v21 = vpop.f32.mrf.mxu3 }
 0x1e4   : > { %v2823_v63 = vadd.f32 %v844_v21, %v770_v36 }
 0x1e8   : > { %2116 = vmatmul.msk.f32.gmra.mxu3 %vm474_vm2, %v2608_v18  ;;  %2154 = vmatmul.msk.f32.gmra.mxu1 %vm474_vm2, %v2564_v35  ;;  %v1280_v35 = vld [vmem:[#allocation3 + $0xac] sm:$0xff]  ;;  %v809_v18 = vadd.f32 %v2639_v54, %v2663_v62  ;;  %v1041_v43 = vpop.f32.mrf.mxu1  ;;  %v2845_v49 = vpop.f32.mrf.mxu2 }
 0x1e9   : > { %2174 = vmatmul.msk.f32.gmra.mxu2 %vm474_vm2, %v1279_v23 }
 0x1eb   : > { %v881_v1 = vpop.f32.mrf.mxu3 }
 0x1ec   : > { %v923_v34 = vadd.f32 %v881_v1, %v806_v17 }
 0x1ee   : > { %v2834_v25 = vadd.f32 %v1023_v14, %v923_v34 }
 0x1f0   : > { %2117 = vmatmul.msk.f32.gmra.mxu3 %vm474_vm2, %v2629_v39  ;;  %2155 = vmatmul.msk.f32.gmra.mxu1 %vm474_vm2, %v2585_v51  ;;  %v812_v51 = vadd.f32 %v2661_v61, %v2675_v4  ;;  %v1044_v54 = vpop.f32.mrf.mxu1  ;;  %v2861_v62 = vpop.f32.mrf.mxu2 }
 0x1f1   : > { %2175 = vmatmul.msk.f32.gmra.mxu2 %vm474_vm2, %v1280_v35 }
 0x1f3   : > { %v884_v30 = vpop.f32.mrf.mxu3 }
 0x1f4   : > { %v924_v59 = vadd.f32 %v884_v30, %v809_v18 }
 0x1f6   : > { %v2843_v36 = vadd.f32 %v1026_v40, %v924_v59 }
 0x1f8   : > { %2118 = vmatmul.msk.f32.gmra.mxu3 %vm474_vm2, %v2645_v55  ;;  %2156 = vmatmul.msk.f32.gmra.mxu1 %vm474_vm2, %v2774_v2  ;;  %v815_v55 = vadd.f32 %v2673_v0, %v2685_v19  ;;  %v1047_v61 = vpop.f32.mrf.mxu1 }
 0x1fb   : > { %v887_v39 = vpop.f32.mrf.mxu3 }
 0x1fc   : > { %v925_v14 = vadd.f32 %v887_v39, %v812_v51  ;;  %v836_v51 = vadd.f32 %v2769_v33, %v2761_v44 }
 0x1fe   : > { %v2853_v46 = vadd.f32 %v1029_v47, %v925_v14 }
 0x200   : > { %2119 = vmatmul.msk.f32.gmra.mxu3 %vm474_vm2, %v2657_v53  ;;  %2157 = vmatmul.msk.f32.gmra.mxu1 %vm474_vm2, %v2783_v38  ;;  %v818_v53 = vadd.f32 %v2687_v12, %v2697_v32  ;;  %v2871_v38 = vpop.f32.mrf.mxu2  ;;  %v1050_v47 = vpop.f32.mrf.mxu1 }
 0x203   : > { %v890_v2 = vpop.f32.mrf.mxu3 }
 0x204   : > { %v926_v40 = vadd.f32 %v890_v2, %v815_v55  ;;  %v958_v55 = vld [vmem:[#allocation3 + $0xaa] sm:$0xff] }
 0x206   : > { %v2863_v10 = vadd.f32 %v1032_v42, %v926_v40  ;;  %v1345_v40 = vpop.f32.mrf.mxu0 }
 0x208   : > { %2120 = vmatmul.msk.f32.gmra.mxu3 %vm474_vm2, %v2669_v3  ;;  %2158 = vmatmul.msk.f32.gmra.mxu1 %vm474_vm2, %v2792_v45  ;;  %v821_v3 = vadd.f32 %v2699_v28, %v2709_v9  ;;  %v2881_v12 = vpop.f32.mrf.mxu2  ;;  %v827_v28 = vadd.f32 %v2731_v24, %v2733_v26  ;;  %v833_v24 = vadd.f32 %v2753_v31, %v2751_v27 }
 0x20b   : > { %v893_v4 = vpop.f32.mrf.mxu3 }
 0x20c   : > { %v927_v0 = vadd.f32 %v893_v4, %v818_v53 }
 0x20e   : > { %v2873_v19 = vadd.f32 %v1035_v48, %v927_v0  ;;  %v1053_v48 = vpop.f32.mrf.mxu1  ;;  %v1348_v33 = vpop.f32.mrf.mxu0 }
 0x210   : > { %2121 = vmatmul.msk.f32.gmra.mxu3 %vm474_vm2, %v2681_v6  ;;  %2159 = vmatmul.msk.f32.gmra.mxu1 %vm474_vm2, %v2801_v56  ;;  %v2891_v21 = vpop.f32.mrf.mxu2 }
 0x213   : > { %v896_v45 = vpop.f32.mrf.mxu3 }
 0x214   : > { %v928_v42 = vadd.f32 %v896_v45, %v821_v3 }
 0x216   : > { %v2883_v32 = vadd.f32 %v1038_v60, %v928_v42  ;;  %v1056_v1 = vpop.f32.mrf.mxu1 }
 0x218   : > { %2122 = vmatmul.msk.f32.gmra.mxu3 %vm474_vm2, %v2693_v7  ;;  %v955_v7 = vld [vmem:[#allocation3 + $0x92] sm:$0xff]  ;;  %v2902_v22 = vpop.f32.mrf.mxu2 }
 0x21b   : > { %v899_v6 = vpop.f32.mrf.mxu3 }
 0x21c   : > { %v929_v52 = vadd.f32 %v899_v6, %v824_v57 }
 0x21e   : > { %v2889_v56 = vadd.f32 %v1041_v43, %v929_v52  ;;  %v1059_v26 = vpop.f32.mrf.mxu1 }
 0x220   : > { %2123 = vmatmul.msk.f32.gmra.mxu3 %vm474_vm2, %v2705_v8  ;;  %v956_v8 = vld [vmem:[#allocation3 + $0x9a] sm:$0xff]  ;;  %v2909_v30 = vpop.f32.mrf.mxu2 }
 0x223   : > { %v902_v9 = vpop.f32.mrf.mxu3 }
 0x224   : > { %v930_v23 = vadd.f32 %v902_v9, %v827_v28 }
 0x226   : > { %v2897_v17 = vadd.f32 %v1044_v54, %v930_v23  ;;  %v1062_v27 = vpop.f32.mrf.mxu1 }
 0x228   : > { %2124 = vmatmul.msk.f32.gmra.mxu3 %vm474_vm2, %v955_v7  ;;  %v2919_v14 = vpop.f32.mrf.mxu2 }
 0x22b   : > { %v905_v60 = vpop.f32.mrf.mxu3 }
 0x22c   : > { %v931_v34 = vadd.f32 %v905_v60, %v830_v20  ;;  %v2935_v20 = vld [vmem:[#allocation6] ss:$0 sm:$0xff] }
 0x22e   : > { %v2904_v35 = vadd.f32 %v1047_v61, %v931_v34  ;;  %v1435_v61 = vpop.f32.mrf.mxu1 }
 0x230   : > { %2125 = vmatmul.msk.f32.gmra.mxu3 %vm474_vm2, %v956_v8  ;;  %v1525_v0 = vpop.f32.mrf.mxu2  ;;  %v1156_v8 = vadd.f32 %v2787_v41, %v2843_v36 }
 0x233   : > { %v908_v18 = vpop.f32.mrf.mxu3 }
 0x234   : > { %v932_v59 = vadd.f32 %v908_v18, %v833_v24 }
 0x236   : > { %v2911_v43 = vadd.f32 %v1050_v47, %v932_v59  ;;  %v1438_v47 = vpop.f32.mrf.mxu1 }
 0x238   : > { %2126 = vmatmul.msk.f32.gmra.mxu3 %vm474_vm2, %v957_v29  ;;  %v1528_v42 = vpop.f32.mrf.mxu2 }
 0x23b   : > { %v911_v39 = vpop.f32.mrf.mxu3 }
 0x23c   : > { %v933_v31 = vadd.f32 %v911_v39, %v836_v51  ;;  %v1157_v51 = vadd.f32 %v2796_v50, %v2853_v46 }
 0x23e   : > { %v2921_v54 = vadd.f32 %v1053_v48, %v933_v31  ;;  %v1351_v48 = vpop.f32.mrf.mxu0  ;;  %v1441_v28 = vpop.f32.mrf.mxu1 }
 0x240   : > { %2127 = vmatmul.msk.f32.gmra.mxu3 %vm474_vm2, %v958_v55  ;;  %v1531_v23 = vpop.f32.mrf.mxu2 }
 0x243   : > { %v914_v2 = vpop.f32.mrf.mxu3 }
 0x244   : > { %v934_v53 = vadd.f32 %v914_v2, %v2805_v58  ;;  %v1155_v58 = vadd.f32 %v2778_v37, %v2834_v25 }
 0x246   : > { %v2925_v4 = vadd.f32 %v1056_v1, %v934_v53  ;;  %v1354_v60 = vpop.f32.mrf.mxu0  ;;  %v1444_v24 = vpop.f32.mrf.mxu1 }
 0x248   : > { %v1534_v59 = vpop.f32.mrf.mxu2 }
 0x24b   : > { %v917_v3 = vpop.f32.mrf.mxu3 }
 0x24c   : > { %v935_v44 = vadd.f32 %v917_v3, %v2814_v16 }
 0x24e   : > { %v2928_v45 = vadd.f32 %v1059_v26, %v935_v44  ;;  %v1447_v36 = vpop.f32.mrf.mxu1  ;;  %v1158_v44 = vadd.f32 %v2812_v15, %v2863_v10  ;;  %v1159_v10 = vadd.f32 %v2821_v5, %v2873_v19 }
 0x253   : > { %v920_v57 = vpop.f32.mrf.mxu3 }
 0x254   : > { %v936_v6 = vadd.f32 %v920_v57, %v2823_v63 }
 0x256   : > { %v2931_v52 = vadd.f32 %v1062_v27, %v936_v6  ;;  %v1357_v27 = vpop.f32.mrf.mxu0 }
 0x25b   : > { %v1203_v9 = vpop.f32.mrf.mxu3 }
 0x25c   : > { %v1245_v7 = vadd.f32 %v1203_v9, %v1155_v58 }
 0x25e   : > { %v1387_v1 = vadd.f32 %v1345_v40, %v1245_v7 }
 0x260   : > { %v1477_v16 = vadd.f32 %v1435_v61, %v1387_v1  ;;  %v1537_v61 = vpop.f32.mrf.mxu2 }
 0x262   : > { %v1567_v34 = vadd.f32 %v1525_v0, %v1477_v16 }
 0x263   : > { %v1206_v63 = vpop.f32.mrf.mxu3 }
 0x264   : > { %v1585_v26 = vadd.f32 %v2935_v20, %v1567_v34  ;;  %v1246_v18 = vadd.f32 %v1206_v63, %v1156_v8 }
 0x266   : > { %v2176_v11 = vmul.f32 -1.442695, %v1585_v26  ;;  %v1388_v37 = vadd.f32 %v1348_v33, %v1246_v18 }
 0x268   : > { %2208 = vpow2.f32 %v2176_v11  ;;  %v1478_v25 = vadd.f32 %v1438_v47, %v1388_v37 }
 0x26a   : > { %v1568_v29 = vadd.f32 %v1528_v42, %v1478_v25  ;;  %v1360_v42 = vpop.f32.mrf.mxu0 }
 0x26b   : > { %v1209_v39 = vpop.f32.mrf.mxu3 }
 0x26c   : > { %v1586_v31 = vadd.f32 %v2935_v20, %v1568_v29  ;;  %v1247_v55 = vadd.f32 %v1209_v39, %v1157_v51 }
 0x26e   : > { %v2209_v41 = vpop.eup %2208  ;;  %v2177_v2 = vmul.f32 -1.442695, %v1586_v31  ;;  %v1389_v40 = vadd.f32 %v1351_v48, %v1247_v55  ;;  %v2946_v48 = vpop.f32.mrf.mxu1 }
 0x26f   : > { %v1641_v53 = vadd.f32 1.0, %v2209_v41 }
 0x270   : > { %2210 = vpow2.f32 %v2177_v2  ;;  %v1479_v0 = vadd.f32 %v1441_v28, %v1389_v40 }
 0x271   : > { %2212 = vrcp.f32 %v1641_v53  ;;  %v1664_v16 = vand.u32 2147483647, %v1641_v53  ;;  %v1666_v34 = vand.u32 2147483648, %v1641_v53  ;;  %vm1660_vm5 = vweird.f32 %v1641_v53 }
 0x272   : > { %v1569_v3 = vadd.f32 %v1531_v23, %v1479_v0  ;;  %v2948_v23 = vpop.f32.mrf.mxu2  ;;  %v1363_v51 = vpop.f32.mrf.mxu0 }
 0x273   : > { %v1212_v33 = vpop.f32.mrf.mxu3  ;;  %v1667_v29 = vor.u32 1.1754944e-38, %v1666_v34  ;;  %vm1665_vm8 = vcmp.eq.f32.partialorder %v1664_v16, 8.507059e+37 }
 0x274   : > { %v1587_v50 = vadd.f32 %v2935_v20, %v1569_v3  ;;  %v1248_v46 = vadd.f32 %v1212_v33, %v1158_v44 }
 0x276   : > { %v2211_v47 = vpop.eup %2210  ;;  %v2178_v57 = vmul.f32 -1.442695, %v1587_v50  ;;  %v1390_v6 = vadd.f32 %v1354_v60, %v1248_v46  ;;  %v1453_v31 = vpop.f32.mrf.mxu1 }
 0x277   : > { %v2213_v58 = vpop.eup %2212  ;;  %v1642_v9 = vadd.f32 1.0, %v2211_v47 }
 0x278   : > { %v1656_v7 = vmul.f32 %v2213_v58, %v1641_v53  ;;  %2214 = vpow2.f32 %v2178_v57  ;;  %v1480_v28 = vadd.f32 %v1444_v24, %v1390_v6  ;;  %vm1661_vm4 = vweird.f32 %v2213_v58 }
 0x279   : > { %2216 = vrcp.f32 %v1642_v9  ;;  %vm1662_vm6 = vmor %vm1660_vm5, %vm1661_vm4  ;;  %v1679_v2 = vand.u32 2147483647, %v1642_v9  ;;  %v1681_v40 = vand.u32 2147483648, %v1642_v9  ;;  %vm1675_vm10 = vweird.f32 %v1642_v9 }
 0x27a   : > { %v1657_v1 = vsub.f32 1.0, %v1656_v7  ;;  %v1570_v15 = vadd.f32 %v1534_v59, %v1480_v28  ;;  %v1543_v0 = vpop.f32.mrf.mxu2 }
 0x27b   : > { %v1215_v8 = vpop.f32.mrf.mxu3  ;;  %vm1680_vm12 = vcmp.eq.f32.partialorder %v1679_v2, 8.507059e+37 }
 0x27c   : > { %v1658_v63 = vmul.f32 %v2213_v58, %v1657_v1  ;;  %v1588_v60 = vadd.f32 %v2935_v20, %v1570_v15  ;;  %v1249_v26 = vadd.f32 %v1215_v8, %v1159_v10  ;;  %v1366_v1 = vpop.f32.mrf.mxu0 }
 0x27e   : > { %v2215_v18 = vpop.eup %2214  ;;  %v1659_v11 = vadd.f32 %v2213_v58, %v1658_v63  ;;  %v2179_v24 = vmul.f32 -1.442695, %v1588_v60  ;;  %v1391_v37 = vadd.f32 %v1357_v27, %v1249_v26  ;;  %v1160_v27 = vadd.f32 %v2832_v13, %v2883_v32  ;;  %v1456_v34 = vpop.f32.mrf.mxu1 }
 0x27f   : > { %v2217_v25 = vpop.eup %2216  ;;  %v1643_v59 = vadd.f32 1.0, %v2215_v18 }
 0x280   : > { %v1663_v5 = vsel %vm1662_vm6, %v2213_v58, %v1659_v11  ;;  %v1671_v19 = vmul.f32 %v2217_v25, %v1642_v9  ;;  %2218 = vpow2.f32 %v2179_v24  ;;  %v1481_v41 = vadd.f32 %v1447_v36, %v1391_v37 }
 0x281   : > { %v1668_v39 = vsel %vm1665_vm8, %v1667_v29, %v1663_v5  ;;  %2220 = vrcp.f32 %v1643_v59  ;;  %vm1676_vm9 = vweird.f32 %v2217_v25  ;;  %v1682_v36 = vor.u32 1.1754944e-38, %v1681_v40 }
 0x282   : > { %1866 = vst.msk [vmem:[#allocation4] sm:$0xff] %vm1865_vm7, %v1668_v39  ;;  %v1672_v55 = vsub.f32 1.0, %v1671_v19  ;;  %v1571_v44 = vadd.f32 %v1537_v61, %v1481_v41  ;;  %vm1677_vm11 = vmor %vm1675_vm10, %vm1676_vm9  ;;  %v1694_v15 = vand.u32 2147483647, %v1643_v59  ;;  %v1696_v10 = vand.u32 2147483648, %v1643_v59  ;;  %v1546_v26 = vpop.f32.mrf.mxu2 }
 0x283   : > { %v1218_v53 = vpop.f32.mrf.mxu3  ;;  %vm1690_vm14 = vweird.f32 %v1643_v59 }
 0x284   : > { %v1673_v3 = vmul.f32 %v2217_v25, %v1672_v55  ;;  %v1250_v33 = vadd.f32 %v1218_v53, %v1160_v27  ;;  %v1589_v47 = vadd.f32 %v2935_v20, %v1571_v44  ;;  %vm1695_vm0 = vcmp.eq.f32.partialorder %v1694_v15, 8.507059e+37  ;;  %v1369_v27 = vpop.f32.mrf.mxu0 }
 0x286   : > { %v2219_v50 = vpop.eup %2218  ;;  %v1674_v46 = vadd.f32 %v2217_v25, %v1673_v3  ;;  %v1392_v57 = vadd.f32 %v1360_v42, %v1250_v33  ;;  %v2180_v32 = vmul.f32 -1.442695, %v1589_v47  ;;  %v1161_v42 = vadd.f32 %v2845_v49, %v2889_v56  ;;  %v1459_v3 = vpop.f32.mrf.mxu1 }
 0x287   : > { %v2221_v6 = vpop.eup %2220  ;;  %v1644_v58 = vadd.f32 1.0, %v2219_v50 }
 0x288   : > { %v1678_v7 = vsel %vm1677_vm11, %v2217_v25, %v1674_v46  ;;  %v1686_v13 = vmul.f32 %v2221_v6, %v1643_v59  ;;  %v1482_v9 = vadd.f32 %v2946_v48, %v1392_v57  ;;  %vm1691_vm13 = vweird.f32 %v2221_v6 }
 0x289   : > { %v1683_v28 = vsel %vm1680_vm12, %v1682_v36, %v1678_v7  ;;  %2222 = vrcp.f32 %v1644_v58  ;;  %vm1692_vm15 = vmor %vm1690_vm14, %vm1691_vm13  ;;  %v1697_v48 = vor.u32 1.1754944e-38, %v1696_v10  ;;  %v1162_v59 = vadd.f32 %v2861_v62, %v2897_v17 }
 0x28a   : > { %1867 = vst.msk [vmem:[#allocation4 + $0x8] sm:$0xff] %vm1865_vm7, %v1683_v28  ;;  %v1687_v61 = vsub.f32 1.0, %v1686_v13  ;;  %2224 = vpow2.f32 %v2180_v32  ;;  %v1572_v63 = vadd.f32 %v2948_v23, %v1482_v9  ;;  %v1709_v55 = vand.u32 2147483647, %v1644_v58  ;;  %v1549_v47 = vpop.f32.mrf.mxu2 }
 0x28b   : > { %v1221_v16 = vpop.f32.mrf.mxu3  ;;  %vm1705_vm2 = vweird.f32 %v1644_v58  ;;  %v1163_v13 = vadd.f32 %v2871_v38, %v2904_v35 }
 0x28c   : > { %v1688_v8 = vmul.f32 %v2221_v6, %v1687_v61  ;;  %v1251_v60 = vadd.f32 %v1221_v16, %v1161_v42  ;;  %v1590_v11 = vadd.f32 %v2935_v20, %v1572_v63  ;;  %vm1710_vm4 = vcmp.eq.f32.partialorder %v1709_v55, 8.507059e+37  ;;  %v1372_v15 = vpop.f32.mrf.mxu0 }
 0x28e   : > { %v1689_v18 = vadd.f32 %v2221_v6, %v1688_v8  ;;  %v1393_v24 = vadd.f32 %v1363_v51, %v1251_v60  ;;  %v2181_v29 = vmul.f32 -1.442695, %v1590_v11  ;;  %v1711_v51 = vand.u32 2147483648, %v1644_v58  ;;  %v1462_v63 = vpop.f32.mrf.mxu1 }
 0x28f   : > { %v2223_v37 = vpop.eup %2222  ;;  %v1164_v11 = vadd.f32 %v2881_v12, %v2911_v43 }
 0x290   : > { %v2225_v25 = vpop.eup %2224  ;;  %v1693_v49 = vsel %vm1692_vm15, %v2221_v6, %v1689_v18  ;;  %v1701_v56 = vmul.f32 %v2223_v37, %v1644_v58  ;;  %v1483_v39 = vadd.f32 %v1453_v31, %v1393_v24  ;;  %2226 = vpow2.f32 %v2181_v29 }
 0x291   : > { %v1698_v5 = vsel %vm1695_vm0, %v1697_v48, %v1693_v49  ;;  %v1645_v19 = vadd.f32 1.0, %v2225_v25  ;;  %vm1706_vm1 = vweird.f32 %v2223_v37  ;;  %v1712_v50 = vor.u32 1.1754944e-38, %v1711_v51 }
 0x292   : > { %1868 = vst.msk [vmem:[#allocation4 + $0x10] sm:$0xff] %vm1865_vm7, %v1698_v5  ;;  %v1702_v23 = vsub.f32 1.0, %v1701_v56  ;;  %v1573_v40 = vadd.f32 %v1543_v0, %v1483_v39  ;;  %vm1707_vm3 = vmor %vm1705_vm2, %vm1706_vm1  ;;  %v1552_v24 = vpop.f32.mrf.mxu2 }
 0x293   : > { %2228 = vrcp.f32 %v1645_v19  ;;  %v1224_v41 = vpop.f32.mrf.mxu3  ;;  %v1724_v9 = vand.u32 2147483647, %v1645_v19  ;;  %v1726_v42 = vand.u32 2147483648, %v1645_v19  ;;  %vm1720_vm6 = vweird.f32 %v1645_v19 }
 0x294   : > { %v1703_v2 = vmul.f32 %v2223_v37, %v1702_v23  ;;  %v1252_v53 = vadd.f32 %v1224_v41, %v1162_v59  ;;  %v1591_v31 = vadd.f32 %v2935_v20, %v1573_v40  ;;  %v1375_v41 = vpop.f32.mrf.mxu0 }
 0x295   : > { %vm1725_vm9 = vcmp.eq.f32.partialorder %v1724_v9, 8.507059e+37 }
 0x296   : > { %v1704_v44 = vadd.f32 %v2223_v37, %v1703_v2  ;;  %v1394_v33 = vadd.f32 %v1366_v1, %v1252_v53  ;;  %v2227_v46 = vpop.eup %2226  ;;  %v2182_v17 = vmul.f32 -1.442695, %v1591_v31 }
 0x297   : > { %v2967_v7 = vadd.f32 1.0, %v2227_v46 }
 0x298   : > { %v1708_v62 = vsel %vm1707_vm3, %v2223_v37, %v1704_v44  ;;  %v1484_v57 = vadd.f32 %v1456_v34, %v1394_v33  ;;  %2230 = vpow2.f32 %v2182_v17  ;;  %v1465_v44 = vpop.f32.mrf.mxu1 }
 0x299   : > { %v2229_v6 = vpop.eup %2228  ;;  %v1713_v36 = vsel %vm1710_vm4, %v1712_v50, %v1708_v62  ;;  %2232 = vrcp.f32 %v2967_v7  ;;  %v1739_v43 = vand.u32 2147483647, %v2967_v7  ;;  %vm1735_vm11 = vweird.f32 %v2967_v7 }
 0x29a   : > { %1869 = vst.msk [vmem:[#allocation4 + $0x18] sm:$0xff] %vm1865_vm7, %v1713_v36  ;;  %v1716_v0 = vmul.f32 %v2229_v6, %v1645_v19  ;;  %v1574_v58 = vadd.f32 %v1546_v26, %v1484_v57  ;;  %vm1721_vm5 = vweird.f32 %v2229_v6  ;;  %v1727_v26 = vor.u32 1.1754944e-38, %v1726_v42  ;;  %v1555_v17 = vpop.f32.mrf.mxu2 }
 0x29b   : > { %v1227_v32 = vpop.f32.mrf.mxu3  ;;  %vm1722_vm8 = vmor %vm1720_vm6, %vm1721_vm5  ;;  %v1741_v19 = vand.u32 2147483648, %v2967_v7  ;;  %vm1740_vm13 = vcmp.eq.f32.partialorder %v1739_v43, 8.507059e+37 }
 0x29c   : > { %v1717_v28 = vsub.f32 1.0, %v1716_v0  ;;  %v1592_v1 = vadd.f32 %v2935_v20, %v1574_v58  ;;  %v1253_v61 = vadd.f32 %v1227_v32, %v1163_v13 }
 0x29d   : > { %v1742_v53 = vor.u32 1.1754944e-38, %v1741_v19 }
 0x29e   : > { %v1718_v10 = vmul.f32 %v2229_v6, %v1717_v28  ;;  %v2183_v16 = vmul.f32 -1.442695, %v1592_v1  ;;  %v1395_v34 = vadd.f32 %v1369_v27, %v1253_v61  ;;  %v2231_v8 = vpop.eup %2230 }
 0x29f   : > { %v2233_v35 = vpop.eup %2232  ;;  %v2974_v18 = vadd.f32 1.0, %v2231_v8 }
 0x2a0   : > { %v1719_v60 = vadd.f32 %v2229_v6, %v1718_v10  ;;  %2234 = vpow2.f32 %v2183_v16  ;;  %v1485_v38 = vadd.f32 %v1459_v3, %v1395_v34  ;;  %v1731_v48 = vmul.f32 %v2233_v35, %v2967_v7  ;;  %v1378_v16 = vpop.f32.mrf.mxu0 }
 0x2a1   : > { %2236 = vrcp.f32 %v2974_v18  ;;  %vm1736_vm10 = vweird.f32 %v2233_v35  ;;  %v1165_v3 = vadd.f32 %v2891_v21, %v2921_v54  ;;  %v1754_v36 = vand.u32 2147483647, %v2974_v18 }
 0x2a2   : > { %v1723_v37 = vsel %vm1722_vm8, %v2229_v6, %v1719_v60  ;;  %v1575_v25 = vadd.f32 %v1549_v47, %v1485_v38  ;;  %v1732_v29 = vsub.f32 1.0, %v1731_v48  ;;  %vm1737_vm12 = vmor %vm1735_vm11, %vm1736_vm10  ;;  %v1880_v6 = vld [vmem:[#allocation4] sm:$0xff]  ;;  %v1756_v7 = vand.u32 2147483648, %v2974_v18  ;;  %v1468_v48 = vpop.f32.mrf.mxu1  ;;  %v1558_v43 = vpop.f32.mrf.mxu2 }
 0x2a3   : > { %v1728_v49 = vsel %vm1725_vm9, %v1727_v26, %v1723_v37  ;;  %v1230_v56 = vpop.f32.mrf.mxu3  ;;  %vm1750_vm15 = vweird.f32 %v2974_v18  ;;  %vm1755_vm1 = vcmp.eq.f32.partialorder %v1754_v36, 8.507059e+37 }
 0x2a4   : > { %1870 = vst.msk [vmem:[#allocation4 + $0x20] sm:$0xff] %vm1865_vm7, %v1728_v49  ;;  %v1593_v5 = vadd.f32 %v2935_v20, %v1575_v25  ;;  %v1254_v12 = vadd.f32 %v1230_v56, %v1164_v11  ;;  %v1733_v23 = vmul.f32 %v2233_v35, %v1732_v29  ;;  %v1757_v10 = vor.u32 1.1754944e-38, %v1756_v7  ;;  %v1881_v29 = vld [vmem:[#allocation4 + $0x8] sm:$0xff] }
 0x2a6   : > { %v2235_v39 = vpop.eup %2234  ;;  %v2184_v59 = vmul.f32 -1.442695, %v1593_v5  ;;  %v1396_v55 = vadd.f32 %v1372_v15, %v1254_v12  ;;  %v1734_v27 = vadd.f32 %v2233_v35, %v1733_v23  ;;  %v1902_v15 = vld [vmem:[#allocation4 + $0x2] sm:$0xff] }
 0x2a7   : > { %v2988_v51 = vadd.f32 1.0, %v2235_v39  ;;  %v2237_v40 = vpop.eup %2236 }
 0x2a8   : > { %2238 = vpow2.f32 %v2184_v59  ;;  %v1486_v2 = vadd.f32 %v1462_v63, %v1396_v55  ;;  %v1738_v31 = vsel %vm1737_vm12, %v2233_v35, %v1734_v27  ;;  %v1746_v33 = vmul.f32 %v2237_v40, %v2974_v18 }
 0x2a9   : > { %2240 = vrcp.f32 %v2988_v51  ;;  %v1743_v47 = vsel %vm1740_vm13, %v1742_v53, %v1738_v31  ;;  %vm1751_vm14 = vweird.f32 %v2237_v40  ;;  %v1769_v18 = vand.u32 2147483647, %v2988_v51  ;;  %v1882_v31 = vld [vmem:[#allocation4 + $0x10] sm:$0xff] }
 0x2aa   : > { %v1576_v50 = vadd.f32 %v1552_v24, %v1486_v2  ;;  %1871 = vst.msk [vmem:[#allocation4 + $0x28] sm:$0xff] %vm1865_vm7, %v1743_v47  ;;  %v1747_v57 = vsub.f32 1.0, %v1746_v33  ;;  %vm1752_vm0 = vmor %vm1750_vm15, %vm1751_vm14  ;;  %v1771_v11 = vand.u32 2147483648, %v2988_v51  ;;  %v1166_v24 = vadd.f32 %v2902_v22, %v2925_v4 }
 0x2ab   : > { %v2996_v46 = vld [vmem:[#allocation4 + $0x20] sm:$0xff]  ;;  %v1233_v62 = vpop.f32.mrf.mxu3  ;;  %vm1765_vm3 = vweird.f32 %v2988_v51  ;;  %vm1770_vm5 = vcmp.eq.f32.partialorder %v1769_v18, 8.507059e+37 }
 0x2ac   : > { %v1594_v21 = vadd.f32 %v2935_v20, %v1576_v50  ;;  %v1255_v54 = vadd.f32 %v1233_v62, %v1165_v3  ;;  %v1893_v58 = vmax.f32 %v1880_v6, %v2996_v46  ;;  %v1748_v13 = vmul.f32 %v2237_v40, %v1747_v57 }
 0x2ad   : > { %v1772_v23 = vor.u32 1.1754944e-38, %v1771_v11 }
 0x2ae   : > { %v2239_v0 = vpop.eup %2238  ;;  %v2185_v32 = vmul.f32 -1.442695, %v1594_v21  ;;  %v1397_v28 = vadd.f32 %v1375_v41, %v1255_v54  ;;  %v1749_v9 = vadd.f32 %v2237_v40, %v1748_v13  ;;  %v1915_v34 = vmax.f32 %v1893_v58, %v1902_v15  ;;  %v1381_v21 = vpop.f32.mrf.mxu0 }
 0x2af   : > { %v2241_v1 = vpop.eup %2240  ;;  %v3008_v61 = vadd.f32 1.0, %v2239_v0  ;;  %v1471_v58 = vpop.f32.mrf.mxu1 }
 0x2b0   : > { %v1761_v42 = vmul.f32 %v2241_v1, %v2988_v51  ;;  %2242 = vpow2.f32 %v2185_v32  ;;  %v1753_v8 = vsel %vm1752_vm0, %v2237_v40, %v1749_v9  ;;  %v1487_v60 = vadd.f32 %v1465_v44, %v1397_v28  ;;  %v1903_v40 = vld [vmem:[#allocation4 + $0xa] sm:$0xff]  ;;  %v1904_v28 = vld [vmem:[#allocation4 + $0x12] sm:$0xff] }
 0x2b1   : > { %2244 = vrcp.f32 %v3008_v61  ;;  %v3020_v38 = vld [vmem:[#allocation4 + $0x28] sm:$0xff]  ;;  %v1758_v26 = vsel %vm1755_vm1, %v1757_v10, %v1753_v8  ;;  %vm1766_vm2 = vweird.f32 %v2241_v1  ;;  %v1784_v47 = vand.u32 2147483647, %v3008_v61 }
 0x2b2   : > { %v1762_v63 = vsub.f32 1.0, %v1761_v42  ;;  %v3022_v35 = vld [vmem:[#allocation4 + $0x22] sm:$0xff]  ;;  %1872 = vst.msk [vmem:[#allocation4 + $0x30] sm:$0xff] %vm1865_vm7, %v1758_v26  ;;  %v1577_v56 = vadd.f32 %v1555_v17, %v1487_v60  ;;  %v1894_v19 = vmax.f32 %v1881_v29, %v3020_v38  ;;  %vm1767_vm4 = vmor %vm1765_vm3, %vm1766_vm2  ;;  %v1786_v62 = vand.u32 2147483648, %v3008_v61  ;;  %v1561_v42 = vpop.f32.mrf.mxu2 }
 0x2b3   : > { %v1236_v37 = vpop.f32.mrf.mxu3  ;;  %v1924_v25 = vmax.f32 %v1915_v34, %v3022_v35  ;;  %v1167_v17 = vadd.f32 %v2909_v30, %v2928_v45  ;;  %vm1780_vm8 = vweird.f32 %v3008_v61  ;;  %vm1785_vm10 = vcmp.eq.f32.partialorder %v1784_v47, 8.507059e+37 }
 0x2b4   : > { %v1763_v49 = vmul.f32 %v2241_v1, %v1762_v63  ;;  %v1256_v5 = vadd.f32 %v1236_v37, %v1166_v24  ;;  %v1595_v22 = vadd.f32 %v2935_v20, %v1577_v56  ;;  %v1916_v3 = vmax.f32 %v1894_v19, %v1903_v40  ;;  %v1883_v37 = vld [vmem:[#allocation4 + $0x18] sm:$0xff] }
 0x2b5   : > { %1933 = vst.msk [vmem:[%s3018_s10] sm:$0xff] %vm1865_vm7, %v1924_v25  ;;  %v1787_v30 = vor.u32 1.1754944e-38, %v1786_v62  ;;  %v1168_v24 = vadd.f32 %v2919_v14, %v2931_v52  ;;  %v1905_v52 = vld [vmem:[#allocation4 + $0x1a] sm:$0xff] }
 0x2b6   : > { %v2243_v12 = vpop.eup %2242  ;;  %v1764_v39 = vadd.f32 %v2241_v1, %v1763_v49  ;;  %v1398_v55 = vadd.f32 %v1378_v16, %v1256_v5  ;;  %v2186_v2 = vmul.f32 -1.442695, %v1595_v22 }
 0x2b7   : > { %v2245_v4 = vpop.eup %2244  ;;  %v3035_v59 = vadd.f32 1.0, %v2243_v12 }
 0x2b8   : > { %v1768_v41 = vsel %vm1767_vm4, %v2241_v1, %v1764_v39  ;;  %v1776_v27 = vmul.f32 %v2245_v4, %v3008_v61  ;;  %v1488_v44 = vadd.f32 %v1468_v48, %v1398_v55  ;;  %vm1781_vm6 = vweird.f32 %v2245_v4 }
 0x2b9   : > { %v1773_v53 = vsel %vm1770_vm5, %v1772_v23, %v1768_v41  ;;  %2246 = vrcp.f32 %v3035_v59  ;;  %v3040_v33 = vld [vmem:[#allocation4 + $0x30] sm:$0xff]  ;;  %vm1782_vm9 = vmor %vm1780_vm8, %vm1781_vm6  ;;  %v1799_v48 = vand.u32 2147483647, %v3035_v59  ;;  %v1801_v25 = vand.u32 2147483648, %v3035_v59 }
 0x2ba   : > { %1873 = vst.msk [vmem:[#allocation4 + $0x38] sm:$0xff] %vm1865_vm7, %v1773_v53  ;;  %v1777_v51 = vsub.f32 1.0, %v1776_v27  ;;  %2248 = vpow2.f32 %v2186_v2  ;;  %v3042_v50 = vld [vmem:[#allocation4 + $0x2a] sm:$0xff]  ;;  %v1895_v54 = vmax.f32 %v1882_v31, %v3040_v33  ;;  %v1578_v7 = vadd.f32 %v1558_v43, %v1488_v44  ;;  %v1384_v43 = vpop.f32.mrf.mxu0 }
 0x2bb   : > { %v1239_v57 = vpop.f32.mrf.mxu3  ;;  %v1925_v6 = vmax.f32 %v1916_v3, %v3042_v50  ;;  %vm1795_vm12 = vweird.f32 %v3035_v59  ;;  %v1802_v39 = vor.u32 1.1754944e-38, %v1801_v25  ;;  %vm1800_vm14 = vcmp.eq.f32.partialorder %v1799_v48, 8.507059e+37 }
 0x2bc   : > { %v1778_v36 = vmul.f32 %v2245_v4, %v1777_v51  ;;  %v1257_v0 = vadd.f32 %v1239_v57, %v1167_v17  ;;  %v1596_v45 = vadd.f32 %v2935_v20, %v1578_v7  ;;  %v1917_v15 = vmax.f32 %v1895_v54, %v1904_v28  ;;  %v1564_v51 = vpop.f32.mrf.mxu2 }
 0x2bd   : > { %1934 = vst.msk [vmem:[%s3018_s10 + $0x8] sm:$0xff] %vm1865_vm7, %v1925_v6 }
 0x2be   : > { %v1779_v13 = vadd.f32 %v2245_v4, %v1778_v36  ;;  %v1399_v1 = vadd.f32 %v1381_v21, %v1257_v0  ;;  %v2187_v60 = vmul.f32 -1.442695, %v1596_v45 }
 0x2bf   : > { %v2247_v32 = vpop.eup %2246 }
 0x2c0   : > { %v2249_v9 = vpop.eup %2248  ;;  %v1783_v10 = vsel %vm1782_vm9, %v2245_v4, %v1779_v13  ;;  %v1791_v16 = vmul.f32 %v2247_v32, %v3035_v59  ;;  %v1489_v26 = vadd.f32 %v1471_v58, %v1399_v1  ;;  %vm1796_vm11 = vweird.f32 %v2247_v32  ;;  %v1474_v4 = vpop.f32.mrf.mxu1 }
 0x2c1   : > { %v3055_v34 = vld [vmem:[#allocation4 + $0x38] sm:$0xff]  ;;  %v1788_v61 = vsel %vm1785_vm10, %v1787_v30, %v1783_v10  ;;  %v3059_v63 = vadd.f32 1.0, %v2249_v9  ;;  %vm1797_vm13 = vmor %vm1795_vm12, %vm1796_vm11 }
 0x2c2   : > { %v3057_v8 = vld [vmem:[#allocation4 + $0x32] sm:$0xff]  ;;  %1874 = vst.msk [vmem:[#allocation4 + $0x40] sm:$0xff] %vm1865_vm7, %v1788_v61  ;;  %v1792_v11 = vsub.f32 1.0, %v1791_v16  ;;  %v1896_v56 = vmax.f32 %v1883_v37, %v3055_v34  ;;  %v1579_v5 = vadd.f32 %v1561_v42, %v1489_v26 }
 0x2c3   : > { %v1926_v18 = vmax.f32 %v1917_v15, %v3057_v8  ;;  %2250 = vrcp.f32 %v3059_v63  ;;  %v1242_v49 = vpop.f32.mrf.mxu3  ;;  %v1816_v21 = vand.u32 2147483648, %v3059_v63  ;;  %v1814_v6 = vand.u32 2147483647, %v3059_v63 }
 0x2c4   : > { %v1793_v29 = vmul.f32 %v2247_v32, %v1792_v11  ;;  %2252 = vpow2.f32 %v2187_v60  ;;  %v1258_v12 = vadd.f32 %v1242_v49, %v1168_v24  ;;  %v1597_v14 = vadd.f32 %v2935_v20, %v1579_v5 }
 0x2c5   : > { %1935 = vst.msk [vmem:[%s3018_s10 + $0x10] sm:$0xff] %vm1865_vm7, %v1926_v18  ;;  %v1918_v23 = vmax.f32 %v1896_v56, %v1905_v52  ;;  %vm1810_vm0 = vweird.f32 %v3059_v63  ;;  %vm1815_vm2 = vcmp.eq.f32.partialorder %v1814_v6, 8.507059e+37 }
 0x2c6   : > { %v1794_v19 = vadd.f32 %v2247_v32, %v1793_v29  ;;  %v1400_v22 = vadd.f32 %v1384_v43, %v1258_v12  ;;  %v2188_v41 = vmul.f32 -1.442695, %v1597_v14 }
 0x2c8   : > { %v1798_v55 = vsel %vm1797_vm13, %v2247_v32, %v1794_v19  ;;  %v1490_v59 = vadd.f32 %v1474_v4, %v1400_v22  ;;  %2254 = vpow2.f32 %v2188_v41  ;;  %v1817_v32 = vor.u32 1.1754944e-38, %v1816_v21 }
 0x2c9   : > { %v2251_v27 = vpop.eup %2250  ;;  %v3074_v2 = vld [vmem:[#allocation4 + $0x40] sm:$0xff]  ;;  %v1803_v53 = vsel %vm1800_vm14, %v1802_v39, %v1798_v55 }
 0x2ca   : > { %v3076_v40 = vld [vmem:[#allocation4 + $0x3a] sm:$0xff]  ;;  %v2253_v3 = vpop.eup %2252  ;;  %1875 = vst.msk [vmem:[#allocation4 + $0x48] sm:$0xff] %vm1865_vm7, %v1803_v53  ;;  %v1806_v31 = vmul.f32 %v2251_v27, %v3059_v63  ;;  %v1580_v62 = vadd.f32 %v1564_v51, %v1490_v59  ;;  %v1897_v17 = vmax.f32 %v2996_v46, %v3074_v2  ;;  %vm1811_vm15 = vweird.f32 %v2251_v27 }
 0x2cb   : > { %v1927_v44 = vmax.f32 %v1918_v23, %v3076_v40  ;;  %v1652_v47 = vadd.f32 1.0, %v2253_v3  ;;  %vm1812_vm1 = vmor %vm1810_vm0, %vm1811_vm15 }
 0x2cc   : > { %v1807_v57 = vsub.f32 1.0, %v1806_v31  ;;  %v1598_v36 = vadd.f32 %v2935_v20, %v1580_v62  ;;  %v1919_v7 = vmax.f32 %v1897_v17, %v3022_v35 }
 0x2cd   : > { %1936 = vst.msk [vmem:[%s3018_s10 + $0x18] sm:$0xff] %vm1865_vm7, %v1927_v44  ;;  %2256 = vrcp.f32 %v1652_v47  ;;  %v1831_v10 = vand.u32 2147483648, %v1652_v47  ;;  %v1829_v61 = vand.u32 2147483647, %v1652_v47  ;;  %vm1825_vm4 = vweird.f32 %v1652_v47 }
 0x2ce   : > { %v1808_v54 = vmul.f32 %v2251_v27, %v1807_v57  ;;  %v2189_v58 = vmul.f32 -1.442695, %v1598_v36  ;;  %v2255_v46 = vpop.eup %2254 }
 0x2cf   : > { %v1653_v45 = vadd.f32 1.0, %v2255_v46  ;;  %v1832_v24 = vor.u32 1.1754944e-38, %v1831_v10  ;;  %vm1830_vm6 = vcmp.eq.f32.partialorder %v1829_v61, 8.507059e+37 }
 0x2d0   : > { %v1809_v0 = vadd.f32 %v2251_v27, %v1808_v54  ;;  %2258 = vpow2.f32 %v2189_v58 }
 0x2d1   : > { %v3090_v13 = vld [vmem:[#allocation4 + $0x42] sm:$0xff]  ;;  %2260 = vrcp.f32 %v1653_v45  ;;  %v1846_v5 = vand.u32 2147483648, %v1653_v45  ;;  %v1844_v43 = vand.u32 2147483647, %v1653_v45  ;;  %vm1840_vm9 = vweird.f32 %v1653_v45 }
 0x2d2   : > { %v1928_v28 = vmax.f32 %v1919_v7, %v3090_v13  ;;  %v1813_v30 = vsel %vm1812_vm1, %v2251_v27, %v1809_v0  ;;  %v1889_v20 = vld [vmem:[#allocation4 + $0x48] sm:$0xff] }
 0x2d3   : > { %v2257_v1 = vpop.eup %2256  ;;  %v1818_v9 = vsel %vm1815_vm2, %v1817_v32, %v1813_v30  ;;  %v1898_v15 = vmax.f32 %v3020_v38, %v1889_v20  ;;  %v1847_v52 = vor.u32 1.1754944e-38, %v1846_v5  ;;  %vm1845_vm11 = vcmp.eq.f32.partialorder %v1844_v43, 8.507059e+37 }
 0x2d4   : > { %1937 = vst.msk [vmem:[%s3018_s10 + $0x20] sm:$0xff] %vm1865_vm7, %v1928_v28  ;;  %v1821_v35 = vmul.f32 %v2257_v1, %v1652_v47  ;;  %vm1826_vm3 = vweird.f32 %v2257_v1 }
 0x2d5   : > { %1876 = vst.msk [vmem:[#allocation4 + $0x50] sm:$0xff] %vm1865_vm7, %v1818_v9  ;;  %v1920_v11 = vmax.f32 %v1898_v15, %v3042_v50  ;;  %vm1827_vm5 = vmor %vm1825_vm4, %vm1826_vm3 }
 0x2d6   : > { %v1822_v42 = vsub.f32 1.0, %v1821_v35  ;;  %v2259_v63 = vpop.eup %2258 }
 0x2d7   : > { %v2261_v60 = vpop.eup %2260  ;;  %v1654_v18 = vadd.f32 1.0, %v2259_v63 }
 0x2d8   : > { %v1823_v16 = vmul.f32 %v2257_v1, %v1822_v42  ;;  %v1836_v37 = vmul.f32 %v2261_v60, %v1653_v45  ;;  %vm1841_vm8 = vweird.f32 %v2261_v60 }
 0x2d9   : > { %2262 = vrcp.f32 %v1654_v18  ;;  %vm1842_vm10 = vmor %vm1840_vm9, %vm1841_vm8  ;;  %v1861_v59 = vand.u32 2147483648, %v1654_v18  ;;  %v1859_v51 = vand.u32 2147483647, %v1654_v18  ;;  %vm1855_vm13 = vweird.f32 %v1654_v18 }
 0x2da   : > { %v1824_v26 = vadd.f32 %v2257_v1, %v1823_v16  ;;  %v1837_v29 = vsub.f32 1.0, %v1836_v37 }
 0x2db   : > { %vm1860_vm15 = vcmp.eq.f32.partialorder %v1859_v51, 8.507059e+37 }
 0x2dc   : > { %v1911_v48 = vld [vmem:[#allocation4 + $0x4a] sm:$0xff]  ;;  %v1828_v25 = vsel %vm1827_vm5, %v2257_v1, %v1824_v26  ;;  %v1838_v12 = vmul.f32 %v2261_v60, %v1837_v29 }
 0x2dd   : > { %v1890_v38 = vld [vmem:[#allocation4 + $0x50] sm:$0xff]  ;;  %v1929_v49 = vmax.f32 %v1920_v11, %v1911_v48  ;;  %v1833_v56 = vsel %vm1830_vm6, %v1832_v24, %v1828_v25 }
 0x2de   : > { %1877 = vst.msk [vmem:[#allocation4 + $0x58] sm:$0xff] %vm1865_vm7, %v1833_v56  ;;  %v1899_v50 = vmax.f32 %v3040_v33, %v1890_v38  ;;  %v1839_v19 = vadd.f32 %v2261_v60, %v1838_v12 }
 0x2df   : > { %1938 = vst.msk [vmem:[%s3018_s10 + $0x28] sm:$0xff] %vm1865_vm7, %v1929_v49  ;;  %v2263_v14 = vpop.eup %2262 }
 0x2e0   : > { %v1843_v39 = vsel %vm1842_vm10, %v2261_v60, %v1839_v19  ;;  %v1851_v22 = vmul.f32 %v2263_v14, %v1654_v18  ;;  %v1921_v4 = vmax.f32 %v1899_v50, %v3057_v8  ;;  %vm1856_vm12 = vweird.f32 %v2263_v14 }
 0x2e1   : > { %v1848_v23 = vsel %vm1845_vm11, %v1847_v52, %v1843_v39  ;;  %vm1857_vm14 = vmor %vm1855_vm13, %vm1856_vm12  ;;  %v1862_v8 = vor.u32 1.1754944e-38, %v1861_v59 }
 0x2e2   : > { %1878 = vst.msk [vmem:[#allocation4 + $0x60] sm:$0xff] %vm1865_vm7, %v1848_v23  ;;  %v1852_v27 = vsub.f32 1.0, %v1851_v22 }
 0x2e4   : > { %v1853_v3 = vmul.f32 %v2263_v14, %v1852_v27 }
 0x2e5   : > { %v1891_v55 = vld [vmem:[#allocation4 + $0x58] sm:$0xff] }
 0x2e6   : > { %v1912_v41 = vld [vmem:[#allocation4 + $0x52] sm:$0xff]  ;;  %v1900_v33 = vmax.f32 %v3055_v34, %v1891_v55  ;;  %v1854_v44 = vadd.f32 %v2263_v14, %v1853_v3 }
 0x2e7   : > { %v1930_v53 = vmax.f32 %v1921_v4, %v1912_v41 }
 0x2e8   : > { %v1922_v31 = vmax.f32 %v1900_v33, %v3076_v40  ;;  %v1858_v47 = vsel %vm1857_vm14, %v2263_v14, %v1854_v44 }
 0x2e9   : > { %1939 = vst.msk [vmem:[%s3018_s10 + $0x30] sm:$0xff] %vm1865_vm7, %v1930_v53  ;;  %v1892_v62 = vld [vmem:[#allocation4 + $0x60] sm:$0xff]  ;;  %v1863_v57 = vsel %vm1860_vm15, %v1862_v8, %v1858_v47 }
 0x2ea   : > { %v1913_v17 = vld [vmem:[#allocation4 + $0x5a] sm:$0xff]  ;;  %1879 = vst.msk [vmem:[#allocation4 + $0x68] sm:$0xff] %vm1865_vm7, %v1863_v57  ;;  %v1901_v34 = vmax.f32 %v3074_v2, %v1892_v62 }
 0x2eb   : > { %v1931_v21 = vmax.f32 %v1922_v31, %v1913_v17 }
 0x2ec   : > { %v1923_v54 = vmax.f32 %v1901_v34, %v3090_v13 }
 0x2ed   : > { %1940 = vst.msk [vmem:[%s3018_s10 + $0x38] sm:$0xff] %vm1865_vm7, %v1931_v21 }
 0x2f1   : > { %v1914_v6 = vld [vmem:[#allocation4 + $0x62] sm:$0xff] }
 0x2f2   : > { %v1932_v36 = vmax.f32 %v1923_v54, %v1914_v6 }
 0x2f4   : > { %1941 = vst.msk [vmem:[%s3018_s10 + $0x40] sm:$0xff] %vm1865_vm7, %v1932_v36 }
 0x2f5 PF: > { %s15_s18 = sadd.s32 1, %s2270_s18  }
 0x2f6   : > { %p12_p5 = scmp.ge.s32.totalorder %s15_s18, 4  }
 0x2f8   :  { %14 = sbr.rel (!%p12_p5) target bundleno = 1 (0x1), region = 78 }

</bundles_post_ra>
